<compile_context>
chip_gen: v6e
topology: v6e:2x2x1
jax: 0.10.0
libtpu: 0.0.40
codegen_flags: <defaults>
</compile_context>

<pallas_src>
import functools

import jax
import jax.numpy as jnp
from jax.experimental import pallas as pl
from jax.experimental.pallas import tpu as pltpu

# Flip to jnp.bfloat16 on v6e/v7x at larger shapes for ~2x MXU throughput
# (accumulation stays f32 via preferred_element_type).  Kept f32 here so the
# demo matches the f32 reference tightly.
MATMUL_DTYPE = jnp.float32


def _round_up(x, m):
    return ((x + m - 1) // m) * m


# ---------------------------------------------------------------------------
# Fused kernel
# ---------------------------------------------------------------------------
def fused_crmatch_kernel(x_ref, wext_ref, bext_ref, wds_ref, bds_ref, pool_ref,
                         wfc_ref, bfc_ref, w1_ref, b1_ref, w2_ref, b2_ref,
                         out_ref, *, tb, cin, hwf, nf, nc):
    """One batch-block of the whole CRMatch forward.

    x_ref:    [tb, cin, hwf]  pixel values, each repeated nf times along lanes
    wext_ref: [cin, hwf]      1x1-conv weight, tiled HW times along lanes
    bext_ref: [1, hwf]        conv bias, tiled HW times
    wds_ref:  [hwf, nf]       ds_classifier weight, rows permuted to NHWC order
    pool_ref: [hwf, nf]       constant (1/HW)-scaled pooling matrix
    out_ref:  [tb, 1, PAD]    packed [feat | logits_ds | logits | logits_rot | 0]
    """
    # ---- backbone.extract: 1x1 conv + bias + ReLU on the VPU (Cin unroll) ----
    xv = x_ref[...]                                   # [tb, cin, hwf]
    wv = wext_ref[...]                                # [cin, hwf]
    acc = jnp.zeros((tb, hwf), jnp.float32) + bext_ref[...]
    for c in range(cin):                              # static unroll, cin tiny
        acc = acc + xv[:, c, :] * wv[c:c + 1, :]
    fm = jnp.maximum(acc, 0.0)                        # NHWC-flat feature map

    fm_mm = fm.astype(MATMUL_DTYPE)

    # ---- ds_classifier: one lane-dense MXU matmul over the flat feature map --
    logits_ds = jnp.dot(fm_mm, wds_ref[...].astype(MATMUL_DTYPE),
                        preferred_element_type=jnp.float32) + bds_ref[...]

    # ---- torch.mean over (H, W) as an MXU matmul (keeps it off the XLU) ------
    feat = jnp.dot(fm_mm, pool_ref[...].astype(MATMUL_DTYPE),
                   preferred_element_type=jnp.float32)          # [tb, nf]

    # ---- logits = backbone(feat, only_fc=True) -------------------------------
    logits = jnp.dot(feat, wfc_ref[...],
                     preferred_element_type=jnp.float32) + bfc_ref[...]

    # ---- rot_classifier: Linear -> ReLU -> Linear ----------------------------
    h = jnp.maximum(
        jnp.dot(feat, w1_ref[...], preferred_element_type=jnp.float32)
        + b1_ref[...], 0.0)
    logits_rot = jnp.dot(h, w2_ref[...],
                         preferred_element_type=jnp.float32) + b2_ref[...]

    # ---- pack all heads into one lane-padded slab: single dense writeback ----
    out_ref[...] = jnp.zeros_like(out_ref)
    out_ref[:, 0, 0:nf] = feat
    out_ref[:, 0, nf:2 * nf] = logits_ds
    out_ref[:, 0, 2 * nf:2 * nf + nc] = logits
    out_ref[:, 0, 2 * nf + nc:2 * nf + nc + 4] = logits_rot


# ---------------------------------------------------------------------------
# One-time weight repack (outside jit; zero runtime cost)
# ---------------------------------------------------------------------------
def prepare_kernel_params(params, H, W):
    F = params["w_ext"].shape[1]
    HW = H * W
    f_ds = params["w_ds"].shape[1]
    # ds rows: NCHW flatten order (f*HW + s) -> NHWC flatten order (s*F + f)
    w_ds_p = (params["w_ds"].reshape(F, HW, f_ds)
              .transpose(1, 0, 2).reshape(HW * F, f_ds))
    return {
        "w_ext_t": jnp.tile(params["w_ext"], (1, HW)),                  # [Cin, HW*F]
        "b_ext_t": jnp.tile(params["b_ext"], (1, HW)),                  # [1,  HW*F]
        "w_ds_p": w_ds_p,                                               # [HW*F, F]
        "b_ds": params["b_ds"],
        "pool": jnp.tile(jnp.eye(F, dtype=jnp.float32) / HW, (HW, 1)),  # [HW*F, F]
        "w_fc": params["w_fc"], "b_fc": params["b_fc"],
        "w_rot1": params["w_rot1"], "b_rot1": params["b_rot1"],
        "w_rot2": params["w_rot2"], "b_rot2": params["b_rot2"],
    }


# ---------------------------------------------------------------------------
# Wrapper
# ---------------------------------------------------------------------------
def crmatch_forward(x, kp):
    B, Cin, H, W = x.shape
    HW = H * W
    F = kp["pool"].shape[1]
    C = kp["w_fc"].shape[1]
    HWF = HW * F
    used = 2 * F + C + 4
    PAD = _round_up(used, 128)

    # One sample per grid step: the "parallel" batch axis shards across v7x's
    # two TensorCores.  At real batch sizes raise TB (multiple of 8) to fill
    # sublanes while keeping >= 2 grid steps.
    TB = 1

    # NCHW spatial flatten is free (row-major); repeating each pixel F times
    # along lanes lets the kernel build the NHWC-flat feature map with pure
    # lane-dense VPU ops — no transposes or in-kernel reshapes anywhere.
    x_rep = jnp.repeat(x.reshape(B, Cin, HW), F, axis=2)     # [B, Cin, HW*F]

    def full2d(shape):
        return pl.BlockSpec(shape, lambda b: (0, 0))

    kernel = functools.partial(fused_crmatch_kernel,
                               tb=TB, cin=Cin, hwf=HWF, nf=F, nc=C)

    flops = (2 * B * HWF * Cin            # extract (VPU)
             + 2 * B * HWF * F            # ds matmul
             + 2 * B * HWF * F            # pooling matmul
             + 2 * B * F * (C + F + 4))   # heads
    bytes_accessed = 4 * (x_rep.size
                          + sum(int(v.size) for v in kp.values())
                          + B * PAD)

    packed = pl.pallas_call(
        kernel,
        out_shape=jax.ShapeDtypeStruct((B, 1, PAD), jnp.float32),
        grid_spec=pltpu.PrefetchScalarGridSpec(
            num_scalar_prefetch=0,
            grid=(B // TB,),
            in_specs=[
                pl.BlockSpec((TB, Cin, HWF), lambda b: (b, 0, 0)),  # x_rep
                full2d((Cin, HWF)),    # w_ext_t
                full2d((1, HWF)),      # b_ext_t
                full2d((HWF, F)),      # w_ds_p
                full2d((1, F)),        # b_ds
                full2d((HWF, F)),      # pool
                full2d((F, C)),        # w_fc
                full2d((1, C)),        # b_fc
                full2d((F, F)),        # w_rot1
                full2d((1, F)),        # b_rot1
                full2d((F, 4)),        # w_rot2
                full2d((1, 4)),        # b_rot2
            ],
            out_specs=pl.BlockSpec((TB, 1, PAD), lambda b: (b, 0, 0)),
        ),
        compiler_params=pltpu.CompilerParams(
            dimension_semantics=("parallel",),
            vmem_limit_bytes=32 * 1024 * 1024,
        ),
        cost_estimate=pl.CostEstimate(flops=flops, transcendentals=0,
                                      bytes_accessed=bytes_accessed),
    )(x_rep, kp["w_ext_t"], kp["b_ext_t"], kp["w_ds_p"], kp["b_ds"], kp["pool"],
      kp["w_fc"], kp["b_fc"], kp["w_rot1"], kp["b_rot1"], kp["w_rot2"],
      kp["b_rot2"])

    packed = packed.reshape(B, PAD)
    feat = packed[:, 0:F]
    logits_ds = packed[:, F:2 * F]
    logits = packed[:, 2 * F:2 * F + C]
    logits_rot = packed[:, 2 * F + C:2 * F + C + 4]
    return {"logits": logits, "logits_ds": logits_ds, "feat": feat,
            "logits_rot": logits_rot}


# ---------------------------------------------------------------------------
# Deterministic synthetic parameters + pure-JAX reference
# ---------------------------------------------------------------------------
def init_params(key, Cin, F, H, W, num_classes):
    ks = jax.random.split(key, 10)

    def lin(k, fan_in, shape):
        return jax.random.normal(k, shape, jnp.float32) / jnp.sqrt(float(fan_in))

    feat_map_size = H * W * F  # 8*8*num_features branch of __init__
    return {
        "w_ext":  lin(ks[0], Cin, (Cin, F)),
        "b_ext":  jnp.full((1, F), 0.01, jnp.float32),
        "w_ds":   lin(ks[1], feat_map_size, (feat_map_size, F)),
        "b_ds":   lin(ks[2], feat_map_size, (1, F)),
        "w_fc":   lin(ks[3], F, (F, num_classes)),
        "b_fc":   lin(ks[4], F, (1, num_classes)),
        "w_rot1": lin(ks[5], F, (F, F)),
        "b_rot1": lin(ks[6], F, (1, F)),
        "w_rot2": lin(ks[7], F, (F, 4)),
        "b_rot2": lin(ks[8], F, (1, 4)),
    }


def reference_forward(x, params):
    B, Cin, H, W = x.shape
    F = params["w_ext"].shape[1]
    x_rows = jnp.transpose(x, (0, 2, 3, 1)).reshape(B * H * W, Cin)
    feat2d = jnp.maximum(x_rows @ params["w_ext"] + params["b_ext"], 0.0)
    feat_nhwc = feat2d.reshape(B, H, W, F)
    feat_flat_nchw = jnp.transpose(feat_nhwc, (0, 3, 1, 2)).reshape(B, F * H * W)
    logits_ds = feat_flat_nchw @ params["w_ds"] + params["b_ds"]
    feat = jnp.mean(feat_nhwc, axis=(1, 2))
    logits = feat @ params["w_fc"] + params["b_fc"]
    h = jnp.maximum(feat @ params["w_rot1"] + params["b_rot1"], 0.0)
    logits_rot = h @ params["w_rot2"] + params["b_rot2"]
    return {"logits": logits, "logits_ds": logits_ds, "feat": feat,
            "logits_rot": logits_rot}


if __name__ == "__main__":
    B, Cin, H, W = 2, 4, 8, 8            # non-stl10/imagenet branch -> 8x8 feat map
    F, num_classes = 32, 10              # num_features=32

    key = jax.random.PRNGKey(0)
    kx, kp_key = jax.random.split(key)
    x = jax.random.normal(kx, (B, Cin, H, W), jnp.float32)
    params = init_params(kp_key, Cin, F, H, W, num_classes)
    kparams = prepare_kernel_params(params, H, W)   # one-time weight repack

    out = jax.jit(crmatch_forward)(x, kparams)
    jax.block_until_ready(out)

    ref = reference_forward(x, params)
    for k in ("logits", "logits_ds", "feat", "logits_rot"):
        assert out[k].shape == ref[k].shape, k
        assert jnp.allclose(out[k], ref[k], atol=1e-2, rtol=1e-2), k

    print("KERNEL_OK")
</pallas_src>

<mosaic_0001>
module attributes {stable_mosaic.version = 11 : i64} {
  func.func @fused_crmatch_kernel(%arg0: i32, %arg1: memref<1x4x2048xf32, #tpu.memory_space<vmem>>, %arg2: memref<4x2048xf32, #tpu.memory_space<vmem>>, %arg3: memref<1x2048xf32, #tpu.memory_space<vmem>>, %arg4: memref<2048x32xf32, #tpu.memory_space<vmem>>, %arg5: memref<1x32xf32, #tpu.memory_space<vmem>>, %arg6: memref<2048x32xf32, #tpu.memory_space<vmem>>, %arg7: memref<32x10xf32, #tpu.memory_space<vmem>>, %arg8: memref<1x10xf32, #tpu.memory_space<vmem>>, %arg9: memref<32x32xf32, #tpu.memory_space<vmem>>, %arg10: memref<1x32xf32, #tpu.memory_space<vmem>>, %arg11: memref<32x4xf32, #tpu.memory_space<vmem>>, %arg12: memref<1x4xf32, #tpu.memory_space<vmem>>, %arg13: memref<1x1x128xf32, #tpu.memory_space<vmem>>) attributes {dimension_semantics = [#tpu.dimension_semantics<parallel>], iteration_bounds = array<i64: 2>, scalar_prefetch = 0 : i64, scratch_operands = 0 : i64, tpu.core_type = #tpu.core_type<tc>, window_params = [{transform_indices = @transform_0, window_bounds = array<i64: 1, 4, 2048>}, {pipeline_mode = #tpu.pipeline_mode<synchronous>, transform_indices = @transform_1, window_bounds = array<i64: 4, 2048>}, {pipeline_mode = #tpu.pipeline_mode<synchronous>, transform_indices = @transform_2, window_bounds = array<i64: 1, 2048>}, {pipeline_mode = #tpu.pipeline_mode<synchronous>, transform_indices = @transform_3, window_bounds = array<i64: 2048, 32>}, {pipeline_mode = #tpu.pipeline_mode<synchronous>, transform_indices = @transform_4, window_bounds = array<i64: 1, 32>}, {pipeline_mode = #tpu.pipeline_mode<synchronous>, transform_indices = @transform_5, window_bounds = array<i64: 2048, 32>}, {pipeline_mode = #tpu.pipeline_mode<synchronous>, transform_indices = @transform_6, window_bounds = array<i64: 32, 10>}, {pipeline_mode = #tpu.pipeline_mode<synchronous>, transform_indices = @transform_7, window_bounds = array<i64: 1, 10>}, {pipeline_mode = #tpu.pipeline_mode<synchronous>, transform_indices = @transform_8, window_bounds = array<i64: 32, 32>}, {pipeline_mode = #tpu.pipeline_mode<synchronous>, transform_indices = @transform_9, window_bounds = array<i64: 1, 32>}, {pipeline_mode = #tpu.pipeline_mode<synchronous>, transform_indices = @transform_10, window_bounds = array<i64: 32, 4>}, {pipeline_mode = #tpu.pipeline_mode<synchronous>, transform_indices = @transform_11, window_bounds = array<i64: 1, 4>}, {transform_indices = @transform_12, window_bounds = array<i64: 1, 1, 128>}]} {
    %c0 = arith.constant 0 : index
    %c0_0 = arith.constant 0 : index
    %c0_1 = arith.constant 0 : index
    %0 = vector.load %arg1[%c0, %c0_0, %c0_1] : memref<1x4x2048xf32, #tpu.memory_space<vmem>>, vector<1x4x2048xf32>
    %c0_2 = arith.constant 0 : index
    %c0_3 = arith.constant 0 : index
    %1 = vector.load %arg2[%c0_2, %c0_3] : memref<4x2048xf32, #tpu.memory_space<vmem>>, vector<4x2048xf32>
    %cst = arith.constant 0.000000e+00 : f32
    %2 = vector.broadcast %cst : f32 to vector<1x2048xf32>
    %c0_4 = arith.constant 0 : index
    %c0_5 = arith.constant 0 : index
    %3 = vector.load %arg3[%c0_4, %c0_5] : memref<1x2048xf32, #tpu.memory_space<vmem>>, vector<1x2048xf32>
    %4 = arith.addf %2, %3 : vector<1x2048xf32>
    %5 = vector.extract_strided_slice %0 {offsets = [0, 0, 0], sizes = [1, 1, 2048], strides = [1, 1, 1]} : vector<1x4x2048xf32> to vector<1x1x2048xf32>
    %6 = vector.shape_cast %5 : vector<1x1x2048xf32> to vector<1x2048xf32>
    %7 = vector.extract_strided_slice %1 {offsets = [0, 0], sizes = [1, 2048], strides = [1, 1]} : vector<4x2048xf32> to vector<1x2048xf32>
    %8 = arith.mulf %6, %7 : vector<1x2048xf32>
    %9 = arith.addf %4, %8 : vector<1x2048xf32>
    %10 = vector.extract_strided_slice %0 {offsets = [0, 1, 0], sizes = [1, 1, 2048], strides = [1, 1, 1]} : vector<1x4x2048xf32> to vector<1x1x2048xf32>
    %11 = vector.shape_cast %10 : vector<1x1x2048xf32> to vector<1x2048xf32>
    %12 = vector.extract_strided_slice %1 {offsets = [1, 0], sizes = [1, 2048], strides = [1, 1]} : vector<4x2048xf32> to vector<1x2048xf32>
    %13 = arith.mulf %11, %12 : vector<1x2048xf32>
    %14 = arith.addf %9, %13 : vector<1x2048xf32>
    %15 = vector.extract_strided_slice %0 {offsets = [0, 2, 0], sizes = [1, 1, 2048], strides = [1, 1, 1]} : vector<1x4x2048xf32> to vector<1x1x2048xf32>
    %16 = vector.shape_cast %15 : vector<1x1x2048xf32> to vector<1x2048xf32>
    %17 = vector.extract_strided_slice %1 {offsets = [2, 0], sizes = [1, 2048], strides = [1, 1]} : vector<4x2048xf32> to vector<1x2048xf32>
    %18 = arith.mulf %16, %17 : vector<1x2048xf32>
    %19 = arith.addf %14, %18 : vector<1x2048xf32>
    %20 = vector.extract_strided_slice %0 {offsets = [0, 3, 0], sizes = [1, 1, 2048], strides = [1, 1, 1]} : vector<1x4x2048xf32> to vector<1x1x2048xf32>
    %21 = vector.shape_cast %20 : vector<1x1x2048xf32> to vector<1x2048xf32>
    %22 = vector.extract_strided_slice %1 {offsets = [3, 0], sizes = [1, 2048], strides = [1, 1]} : vector<4x2048xf32> to vector<1x2048xf32>
    %23 = arith.mulf %21, %22 : vector<1x2048xf32>
    %24 = arith.addf %19, %23 : vector<1x2048xf32>
    %cst_6 = arith.constant 0.000000e+00 : f32
    %25 = vector.broadcast %cst_6 : f32 to vector<1x2048xf32>
    %26 = arith.maximumf %24, %25 : vector<1x2048xf32>
    %c0_7 = arith.constant 0 : index
    %c0_8 = arith.constant 0 : index
    %27 = vector.load %arg4[%c0_7, %c0_8] : memref<2048x32xf32, #tpu.memory_space<vmem>>, vector<2048x32xf32>
    %cst_9 = arith.constant dense<0.000000e+00> : vector<1x32xf32>
    %28 = tpu.matmul %26, %27, %cst_9 {dimension_numbers = #tpu.dot_dimension_numbers<[1], [0], [0], [1], [0, 0, 1, 1], [], []>} : vector<1x2048xf32>, vector<2048x32xf32>, vector<1x32xf32> -> vector<1x32xf32>
    %c0_10 = arith.constant 0 : index
    %c0_11 = arith.constant 0 : index
    %29 = vector.load %arg5[%c0_10, %c0_11] : memref<1x32xf32, #tpu.memory_space<vmem>>, vector<1x32xf32>
    %30 = arith.addf %28, %29 : vector<1x32xf32>
    %c0_12 = arith.constant 0 : index
    %c0_13 = arith.constant 0 : index
    %31 = vector.load %arg6[%c0_12, %c0_13] : memref<2048x32xf32, #tpu.memory_space<vmem>>, vector<2048x32xf32>
    %cst_14 = arith.constant dense<0.000000e+00> : vector<1x32xf32>
    %32 = tpu.matmul %26, %31, %cst_14 {dimension_numbers = #tpu.dot_dimension_numbers<[1], [0], [0], [1], [0, 0, 1, 1], [], []>} : vector<1x2048xf32>, vector<2048x32xf32>, vector<1x32xf32> -> vector<1x32xf32>
    %c0_15 = arith.constant 0 : index
    %c0_16 = arith.constant 0 : index
    %33 = vector.load %arg7[%c0_15, %c0_16] : memref<32x10xf32, #tpu.memory_space<vmem>>, vector<32x10xf32>
    %cst_17 = arith.constant dense<0.000000e+00> : vector<1x10xf32>
    %34 = tpu.matmul %32, %33, %cst_17 {dimension_numbers = #tpu.dot_dimension_numbers<[1], [0], [0], [1], [0, 0, 1, 1], [], []>} : vector<1x32xf32>, vector<32x10xf32>, vector<1x10xf32> -> vector<1x10xf32>
    %c0_18 = arith.constant 0 : index
    %c0_19 = arith.constant 0 : index
    %35 = vector.load %arg8[%c0_18, %c0_19] : memref<1x10xf32, #tpu.memory_space<vmem>>, vector<1x10xf32>
    %36 = arith.addf %34, %35 : vector<1x10xf32>
    %c0_20 = arith.constant 0 : index
    %c0_21 = arith.constant 0 : index
    %37 = vector.load %arg9[%c0_20, %c0_21] : memref<32x32xf32, #tpu.memory_space<vmem>>, vector<32x32xf32>
    %cst_22 = arith.constant dense<0.000000e+00> : vector<1x32xf32>
    %38 = tpu.matmul %32, %37, %cst_22 {dimension_numbers = #tpu.dot_dimension_numbers<[1], [0], [0], [1], [0, 0, 1, 1], [], []>} : vector<1x32xf32>, vector<32x32xf32>, vector<1x32xf32> -> vector<1x32xf32>
    %c0_23 = arith.constant 0 : index
    %c0_24 = arith.constant 0 : index
    %39 = vector.load %arg10[%c0_23, %c0_24] : memref<1x32xf32, #tpu.memory_space<vmem>>, vector<1x32xf32>
    %40 = arith.addf %38, %39 : vector<1x32xf32>
    %cst_25 = arith.constant 0.000000e+00 : f32
    %41 = vector.broadcast %cst_25 : f32 to vector<1x32xf32>
    %42 = arith.maximumf %40, %41 : vector<1x32xf32>
    %c0_26 = arith.constant 0 : index
    %c0_27 = arith.constant 0 : index
    %43 = vector.load %arg11[%c0_26, %c0_27] : memref<32x4xf32, #tpu.memory_space<vmem>>, vector<32x4xf32>
    %cst_28 = arith.constant dense<0.000000e+00> : vector<1x4xf32>
    %44 = tpu.matmul %42, %43, %cst_28 {dimension_numbers = #tpu.dot_dimension_numbers<[1], [0], [0], [1], [0, 0, 1, 1], [], []>} : vector<1x32xf32>, vector<32x4xf32>, vector<1x4xf32> -> vector<1x4xf32>
    %c0_29 = arith.constant 0 : index
    %c0_30 = arith.constant 0 : index
    %45 = vector.load %arg12[%c0_29, %c0_30] : memref<1x4xf32, #tpu.memory_space<vmem>>, vector<1x4xf32>
    %46 = arith.addf %44, %45 : vector<1x4xf32>
    %cst_31 = arith.constant 0.000000e+00 : f32
    %47 = vector.broadcast %cst_31 : f32 to vector<1x1x128xf32>
    %c0_32 = arith.constant 0 : index
    %c0_33 = arith.constant 0 : index
    %c0_34 = arith.constant 0 : index
    %48 = vector.load %arg13[%c0_32, %c0_33, %c0_34] : memref<1x1x128xf32, #tpu.memory_space<vmem>>, vector<1x1x128xf32>
    tpu.vector_store %arg13[%c0_32, %c0_33, %c0_34], %47 {strides = array<i32>} : memref<1x1x128xf32, #tpu.memory_space<vmem>>, vector<1x1x128xf32>,
    %c0_35 = arith.constant 0 : index
    %c0_36 = arith.constant 0 : index
    %c0_37 = arith.constant 0 : index
    %49 = vector.load %arg13[%c0_35, %c0_36, %c0_37] : memref<1x1x128xf32, #tpu.memory_space<vmem>>, vector<1x1x32xf32>
    %50 = vector.shape_cast %49 : vector<1x1x32xf32> to vector<1x32xf32>
    %51 = vector.shape_cast %32 : vector<1x32xf32> to vector<1x1x32xf32>
    tpu.vector_store %arg13[%c0_35, %c0_36, %c0_37], %51 {strides = array<i32>} : memref<1x1x128xf32, #tpu.memory_space<vmem>>, vector<1x1x32xf32>,
    %c0_38 = arith.constant 0 : index
    %c0_39 = arith.constant 0 : index
    %c32 = arith.constant 32 : index
    %52 = vector.load %arg13[%c0_38, %c0_39, %c32] : memref<1x1x128xf32, #tpu.memory_space<vmem>>, vector<1x1x32xf32>
    %53 = vector.shape_cast %52 : vector<1x1x32xf32> to vector<1x32xf32>
    %54 = vector.shape_cast %30 : vector<1x32xf32> to vector<1x1x32xf32>
    tpu.vector_store %arg13[%c0_38, %c0_39, %c32], %54 {strides = array<i32>} : memref<1x1x128xf32, #tpu.memory_space<vmem>>, vector<1x1x32xf32>,
    %c0_40 = arith.constant 0 : index
    %c0_41 = arith.constant 0 : index
    %c64 = arith.constant 64 : index
    %55 = vector.load %arg13[%c0_40, %c0_41, %c64] : memref<1x1x128xf32, #tpu.memory_space<vmem>>, vector<1x1x10xf32>
    %56 = vector.shape_cast %55 : vector<1x1x10xf32> to vector<1x10xf32>
    %57 = vector.shape_cast %36 : vector<1x10xf32> to vector<1x1x10xf32>
    tpu.vector_store %arg13[%c0_40, %c0_41, %c64], %57 {strides = array<i32>} : memref<1x1x128xf32, #tpu.memory_space<vmem>>, vector<1x1x10xf32>,
    %c0_42 = arith.constant 0 : index
    %c0_43 = arith.constant 0 : index
    %c74 = arith.constant 74 : index
    %58 = vector.load %arg13[%c0_42, %c0_43, %c74] : memref<1x1x128xf32, #tpu.memory_space<vmem>>, vector<1x1x4xf32>
    %59 = vector.shape_cast %58 : vector<1x1x4xf32> to vector<1x4xf32>
    %60 = vector.shape_cast %46 : vector<1x4xf32> to vector<1x1x4xf32>
    tpu.vector_store %arg13[%c0_42, %c0_43, %c74], %60 {strides = array<i32>} : memref<1x1x128xf32, #tpu.memory_space<vmem>>, vector<1x1x4xf32>,
    return
  }
  func.func @transform_0(%arg0: i32) -> (i32, i32, i32) {
    %c0_i32 = arith.constant 0 : i32
    %c0_i32_0 = arith.constant 0 : i32
    %c0_i32_1 = arith.constant 0 : i32
    return %arg0, %c0_i32, %c0_i32_0 : i32, i32, i32
  }
  func.func @transform_1(%arg0: i32) -> (i32, i32) {
    %c0_i32 = arith.constant 0 : i32
    %c0_i32_0 = arith.constant 0 : i32
    %c0_i32_1 = arith.constant 0 : i32
    return %c0_i32, %c0_i32_0 : i32, i32
  }
  func.func @transform_2(%arg0: i32) -> (i32, i32) {
    %c0_i32 = arith.constant 0 : i32
    %c0_i32_0 = arith.constant 0 : i32
    %c0_i32_1 = arith.constant 0 : i32
    return %c0_i32, %c0_i32_0 : i32, i32
  }
  func.func @transform_3(%arg0: i32) -> (i32, i32) {
    %c0_i32 = arith.constant 0 : i32
    %c0_i32_0 = arith.constant 0 : i32
    %c0_i32_1 = arith.constant 0 : i32
    return %c0_i32, %c0_i32_0 : i32, i32
  }
  func.func @transform_4(%arg0: i32) -> (i32, i32) {
    %c0_i32 = arith.constant 0 : i32
    %c0_i32_0 = arith.constant 0 : i32
    %c0_i32_1 = arith.constant 0 : i32
    return %c0_i32, %c0_i32_0 : i32, i32
  }
  func.func @transform_5(%arg0: i32) -> (i32, i32) {
    %c0_i32 = arith.constant 0 : i32
    %c0_i32_0 = arith.constant 0 : i32
    %c0_i32_1 = arith.constant 0 : i32
    return %c0_i32, %c0_i32_0 : i32, i32
  }
  func.func @transform_6(%arg0: i32) -> (i32, i32) {
    %c0_i32 = arith.constant 0 : i32
    %c0_i32_0 = arith.constant 0 : i32
    %c0_i32_1 = arith.constant 0 : i32
    return %c0_i32, %c0_i32_0 : i32, i32
  }
  func.func @transform_7(%arg0: i32) -> (i32, i32) {
    %c0_i32 = arith.constant 0 : i32
    %c0_i32_0 = arith.constant 0 : i32
    %c0_i32_1 = arith.constant 0 : i32
    return %c0_i32, %c0_i32_0 : i32, i32
  }
  func.func @transform_8(%arg0: i32) -> (i32, i32) {
    %c0_i32 = arith.constant 0 : i32
    %c0_i32_0 = arith.constant 0 : i32
    %c0_i32_1 = arith.constant 0 : i32
    return %c0_i32, %c0_i32_0 : i32, i32
  }
  func.func @transform_9(%arg0: i32) -> (i32, i32) {
    %c0_i32 = arith.constant 0 : i32
    %c0_i32_0 = arith.constant 0 : i32
    %c0_i32_1 = arith.constant 0 : i32
    return %c0_i32, %c0_i32_0 : i32, i32
  }
  func.func @transform_10(%arg0: i32) -> (i32, i32) {
    %c0_i32 = arith.constant 0 : i32
    %c0_i32_0 = arith.constant 0 : i32
    %c0_i32_1 = arith.constant 0 : i32
    return %c0_i32, %c0_i32_0 : i32, i32
  }
  func.func @transform_11(%arg0: i32) -> (i32, i32) {
    %c0_i32 = arith.constant 0 : i32
    %c0_i32_0 = arith.constant 0 : i32
    %c0_i32_1 = arith.constant 0 : i32
    return %c0_i32, %c0_i32_0 : i32, i32
  }
  func.func @transform_12(%arg0: i32) -> (i32, i32, i32) {
    %c0_i32 = arith.constant 0 : i32
    %c0_i32_0 = arith.constant 0 : i32
    %c0_i32_1 = arith.constant 0 : i32
    return %arg0, %c0_i32, %c0_i32_0 : i32, i32, i32
  }
}

</mosaic_0001>

<bundles_post_ra>
// kernel: crmatch_forward.1
= control target key start
LH: loop header
LB: loop body
LE: loop exit
PB: predicated region body
PF: predicated region fallthrough
CT: control target
= control target key end

     0   :  { %s3322_s21 = smov 0   ;;  %s5141_s0 = inlined_call_operand.vmem [shape: f32[2,4,2048], index: 0, kind: input, shape index: {}]   ;;  %s5142_s1 = inlined_call_operand.vmem [shape: f32[4,2048], index: 1, kind: input, shape index: {}]   ;;  %s5143_s2 = inlined_call_operand.vmem [shape: f32[1,2048], index: 2, kind: input, shape index: {}]   ;;  %s5144_s3 = inlined_call_operand.vmem [shape: f32[2048,32], index: 3, kind: input, shape index: {}]   ;;  %s5145_s4 = inlined_call_operand.vmem [shape: f32[1,32], index: 4, kind: input, shape index: {}]   ;;  %s5146_s5 = inlined_call_operand.vmem [shape: f32[2048,32], index: 5, kind: input, shape index: {}]   ;;  %s5147_s6 = inlined_call_operand.vmem [shape: f32[32,10], index: 6, kind: input, shape index: {}]   ;;  %s5148_s7 = inlined_call_operand.vmem [shape: f32[1,10], index: 7, kind: input, shape index: {}]   ;;  %s5149_s8 = inlined_call_operand.vmem [shape: f32[32,32], index: 8, kind: input, shape index: {}]   ;;  %s5150_s9 = inlined_call_operand.vmem [shape: f32[1,32], index: 9, kind: input, shape index: {}]   ;;  %s5151_s10 = inlined_call_operand.vmem [shape: f32[32,4], index: 10, kind: input, shape index: {}]   ;;  %s5152_s11 = inlined_call_operand.vmem [shape: f32[1,4], index: 11, kind: input, shape index: {}]   ;;  %s5153_s12 = inlined_call_operand.vmem [shape: f32[2,1,128], index: 12, kind: output, shape index: {}]  }
   0x1 LB: > { %s2608_s22 = sadd.s32 4294967295, %s3249_s21   ;;  %p2612_p0 = scmp.ge.s32.totalorder %s3249_s21, 1  ;;  %s3249_s21 = sphi %s3322_s21, %s22_s21  }
   0x2   : > { %p362_p1 = scmp.lt.s32.totalorder %s3249_s21, 3 }
   0x4   : > { %p363_p2 = pnand %p2612_p0, %p362_p1 }
   0x5   : > { %p3392_p3 = scmp.lt.s32.totalorder (!%p363_p2), %s2608_s22, 1  ;;  %s3255_s27 = smov (!%p363_p2), 64  }
   0x6   : > { %366 = sbr.rel (%p363_p2) target bundleno = 1002 (0x3ea), region = 68  ;;  %s3256_s29 = smov (!%p363_p2), 74  }
   0xb   : > { %v623_v0 = vld [vmem:[%s5144_s3 + $0xf8] sm:$0xff]  ;;  %v622_v4 = vld [vmem:[%s5144_s3 + $0xf0] sm:$0xff]  ;;  %v621_v8 = vld [vmem:[%s5144_s3 + $0xe8] sm:$0xff]  ;;  %s5156_s22 = smov (!%p3392_p3, %s2608_s22), 1  ;;  %v3251_v32 = vmov 1966171168   ;;  %v449_v34 = vlaneseq }
   0xc   : > { %v655_v1 = vld [vmem:[%s5144_s3 + $0x1f8] sm:$0xff]  ;;  %2621 = vmatprep.subr.mxu0 %v623_v0  ;;  %v654_v5 = vld [vmem:[%s5144_s3 + $0x1f0] sm:$0xff]  ;;  %v653_v9 = vld [vmem:[%s5144_s3 + $0x1e8] sm:$0xff]  ;;  %v447_v33 = vunpack.c.l.s4 %v3251_v32  ;;  %s2620_s15 = sshll.u32 %s5156_s22, 6  ;;  %s5096_s30 = scalar_lea.vmem %s5153_s12, %s5156_s22  ;;  %vm3254_vm0 = vmmov 0   ;;  %vm2312_vm1 = vcmask 261120  }
   0xd   : > { %v607_v2 = vld [vmem:[%s5144_s3 + $0x78] sm:$0xff]  ;;  %2656 = vmatprep.subr.mxu1 %v655_v1  ;;  %v606_v6 = vld [vmem:[%s5144_s3 + $0x70] sm:$0xff]  ;;  %v605_v10 = vld [vmem:[%s5144_s3 + $0x68] sm:$0xff]  ;;  %v3466_v45 = vshrl.u32 %v449_v34, 7  ;;  %s3480_s19 = scalar_lea.vmem %s5141_s0, %s2620_s15  ;;  %vm2541_vm2 = vcmask 253952   ;;  %vm2547_vm3 = vcmask 516352  }
   0xe   : > { %v639_v3 = vld [vmem:[%s5144_s3 + $0x178] sm:$0xff]  ;;  %2622 = vmatpush3.msra.mxu0 %v607_v2  ;;  %v638_v7 = vld [vmem:[%s5144_s3 + $0x170] sm:$0xff]  ;;  %v637_v11 = vld [vmem:[%s5144_s3 + $0x168] sm:$0xff]  ;;  %v448_v44 = vunpack.c.0.s8 %v447_v33  ;;  %vm2553_vm4 = vcmask 598528   ;;  %vm2559_vm5 = vcmask 631376  }
   0xf   : > { %2657 = vmatpush3.msra.mxu1 %v639_v3  ;;  %2623 = vmatprep.subr.mxu0 %v622_v4  ;;  %v620_v12 = vld [vmem:[%s5144_s3 + $0xe0] sm:$0xff]  ;;  %v619_v16 = vld [vmem:[%s5144_s3 + $0xd8] sm:$0xff]  ;;  %v618_v20 = vld [vmem:[%s5144_s3 + $0xd0] sm:$0xff] }
  0x10   : > { %2658 = vmatprep.subr.mxu1 %v654_v5  ;;  %2624 = vmatpush3.msra.mxu0 %v606_v6  ;;  %v652_v13 = vld [vmem:[%s5144_s3 + $0x1e0] sm:$0xff]  ;;  %v651_v17 = vld [vmem:[%s5144_s3 + $0x1d8] sm:$0xff]  ;;  %v650_v21 = vld [vmem:[%s5144_s3 + $0x1d0] sm:$0xff]  ;;  %v3507_v59 = vsub.s32 %v448_v44, %v3466_v45  ;;  %v861_v44 = vsub.s32 2, %v3466_v45 }
  0x11   : > { %2659 = vmatpush3.msra.mxu1 %v638_v7  ;;  %2625 = vmatprep.subr.mxu0 %v621_v8  ;;  %v604_v14 = vld [vmem:[%s5144_s3 + $0x60] sm:$0xff]  ;;  %v603_v18 = vld [vmem:[%s5144_s3 + $0x58] sm:$0xff]  ;;  %v602_v22 = vld [vmem:[%s5144_s3 + $0x50] sm:$0xff] }
  0x12   : > { %2660 = vmatprep.subr.mxu1 %v653_v9  ;;  %v636_v15 = vld [vmem:[%s5144_s3 + $0x160] sm:$0xff]  ;;  %2626 = vmatpush3.msra.mxu0 %v605_v10  ;;  %v635_v19 = vld [vmem:[%s5144_s3 + $0x158] sm:$0xff]  ;;  %v634_v23 = vld [vmem:[%s5144_s3 + $0x150] sm:$0xff] }
  0x13   : > { %2661 = vmatpush3.msra.mxu1 %v637_v11  ;;  %2627 = vmatprep.subr.mxu0 %v620_v12  ;;  %v617_v24 = vld [vmem:[%s5144_s3 + $0xc8] sm:$0xff]  ;;  %v616_v28 = vld [vmem:[%s5144_s3 + $0xc0] sm:$0xff]  ;;  %v615_v35 = vld [vmem:[%s5144_s3 + $0xb8] sm:$0xff] }
  0x14   : > { %2662 = vmatprep.subr.mxu1 %v652_v13  ;;  %2628 = vmatpush3.msra.mxu0 %v604_v14  ;;  %v649_v25 = vld [vmem:[%s5144_s3 + $0x1c8] sm:$0xff]  ;;  %v648_v29 = vld [vmem:[%s5144_s3 + $0x1c0] sm:$0xff]  ;;  %v647_v36 = vld [vmem:[%s5144_s3 + $0x1b8] sm:$0xff] }
  0x15   : > { %2663 = vmatpush3.msra.mxu1 %v636_v15  ;;  %2629 = vmatprep.subr.mxu0 %v619_v16  ;;  %v601_v26 = vld [vmem:[%s5144_s3 + $0x48] sm:$0xff]  ;;  %v600_v30 = vld [vmem:[%s5144_s3 + $0x40] sm:$0xff]  ;;  %v599_v37 = vld [vmem:[%s5144_s3 + $0x38] sm:$0xff] }
  0x16   : > { %2664 = vmatprep.subr.mxu1 %v651_v17  ;;  %2630 = vmatpush3.msra.mxu0 %v603_v18  ;;  %v633_v27 = vld [vmem:[%s5144_s3 + $0x148] sm:$0xff]  ;;  %v632_v31 = vld [vmem:[%s5144_s3 + $0x140] sm:$0xff]  ;;  %v631_v38 = vld [vmem:[%s5144_s3 + $0x138] sm:$0xff] }
  0x17   : > { %2665 = vmatpush3.msra.mxu1 %v635_v19  ;;  %2631 = vmatprep.subr.mxu0 %v618_v20  ;;  %v614_v39 = vld [vmem:[%s5144_s3 + $0xb0] sm:$0xff]  ;;  %v613_v43 = vld [vmem:[%s5144_s3 + $0xa8] sm:$0xff]  ;;  %v612_v49 = vld [vmem:[%s5144_s3 + $0xa0] sm:$0xff] }
  0x18   : > { %2666 = vmatprep.subr.mxu1 %v650_v21  ;;  %2632 = vmatpush3.msra.mxu0 %v602_v22  ;;  %v646_v40 = vld [vmem:[%s5144_s3 + $0x1b0] sm:$0xff]  ;;  %v645_v46 = vld [vmem:[%s5144_s3 + $0x1a8] sm:$0xff]  ;;  %v644_v50 = vld [vmem:[%s5144_s3 + $0x1a0] sm:$0xff] }
  0x19   : > { %2667 = vmatpush3.msra.mxu1 %v634_v23  ;;  %2633 = vmatprep.subr.mxu0 %v617_v24  ;;  %v598_v41 = vld [vmem:[%s5144_s3 + $0x30] sm:$0xff]  ;;  %v597_v47 = vld [vmem:[%s5144_s3 + $0x28] sm:$0xff]  ;;  %v596_v51 = vld [vmem:[%s5144_s3 + $0x20] sm:$0xff] }
  0x1a   : > { %2668 = vmatprep.subr.mxu1 %v649_v25  ;;  %2634 = vmatpush3.msra.mxu0 %v601_v26  ;;  %v630_v42 = vld [vmem:[%s5144_s3 + $0x130] sm:$0xff]  ;;  %v629_v48 = vld [vmem:[%s5144_s3 + $0x128] sm:$0xff]  ;;  %v628_v52 = vld [vmem:[%s5144_s3 + $0x120] sm:$0xff] }
  0x1b   : > { %2669 = vmatpush3.msra.mxu1 %v633_v27  ;;  %2635 = vmatprep.subr.mxu0 %v616_v28  ;;  %v611_v53 = vld [vmem:[%s5144_s3 + $0x98] sm:$0xff]  ;;  %v410_v56 = vld [vmem:[%s3480_s19] sm:$0xff]  ;;  %v411_v57 = vld [vmem:[%s3480_s19 + $0x8] sm:$0xff] }
  0x1c   : > { %2670 = vmatprep.subr.mxu1 %v648_v29  ;;  %2636 = vmatpush3.msra.mxu0 %v600_v30  ;;  %v643_v54 = vld [vmem:[%s5144_s3 + $0x198] sm:$0xff]  ;;  %v412_v58 = vld [vmem:[%s3480_s19 + $0x10] sm:$0xff]  ;;  %v418_v61 = vld [vmem:[%s5142_s1] sm:$0xff] }
  0x1d   : > { %2671 = vmatpush3.msra.mxu1 %v632_v31  ;;  %2637 = vmatprep.subr.mxu0 %v615_v35  ;;  %v595_v55 = vld [vmem:[%s5144_s3 + $0x18] sm:$0xff]  ;;  %v419_v62 = vld [vmem:[%s5142_s1 + $0x8] sm:$0xff]  ;;  %v420_v0 = vld [vmem:[%s5142_s1 + $0x10] sm:$0xff]  ;;  %v430_v2 = vmul.f32 %v418_v61, %v410_v56 }
  0x1e   : > { %2672 = vmatprep.subr.mxu1 %v647_v36  ;;  %2638 = vmatpush3.msra.mxu0 %v599_v37  ;;  %v413_v60 = vld [vmem:[%s3480_s19 + $0x18] sm:$0xff]  ;;  %v431_v3 = vmul.f32 %v419_v62, %v411_v57  ;;  %v610_v4 = vld [vmem:[%s5144_s3 + $0x90] sm:$0xff]  ;;  %v432_v6 = vmul.f32 %v420_v0, %v412_v58  ;;  %v609_v12 = vld [vmem:[%s5144_s3 + $0x88] sm:$0xff] }
  0x1f   : > { %2673 = vmatpush3.msra.mxu1 %v631_v38  ;;  %2639 = vmatprep.subr.mxu0 %v614_v39  ;;  %v627_v63 = vld [vmem:[%s5144_s3 + $0x118] sm:$0xff]  ;;  %v642_v5 = vld [vmem:[%s5144_s3 + $0x190] sm:$0xff]  ;;  %v452_v10 = vrot.slane %v430_v2, %v3507_v59  ;;  %v641_v13 = vld [vmem:[%s5144_s3 + $0x188] sm:$0xff] }
  0x20   : > { %2674 = vmatprep.subr.mxu1 %v646_v40  ;;  %2640 = vmatpush3.msra.mxu0 %v598_v41  ;;  %v421_v1 = vld [vmem:[%s5142_s1 + $0x18] sm:$0xff]  ;;  %v594_v8 = vld [vmem:[%s5144_s3 + $0x10] sm:$0xff]  ;;  %v459_v11 = vrot.slane %v431_v3, %v3507_v59  ;;  %v466_v14 = vrot.slane %v432_v6, %v3507_v59  ;;  %v593_v16 = vld [vmem:[%s5144_s3 + $0x8] sm:$0xff]  ;;  %v857_v40 = vsub.s32 1, %v3466_v45 }
  0x21   : > { %2675 = vmatpush3.msra.mxu1 %v630_v42  ;;  %2641 = vmatprep.subr.mxu0 %v613_v43  ;;  %v433_v7 = vmul.f32 %v421_v1, %v413_v60  ;;  %v626_v9 = vld [vmem:[%s5144_s3 + $0x110] sm:$0xff]  ;;  %v625_v17 = vld [vmem:[%s5144_s3 + $0x108] sm:$0xff]  ;;  %v608_v20 = vld [vmem:[%s5144_s3 + $0x80] sm:$0xff]  ;;  %v853_v42 = vsub.s32 0, %v3466_v45  ;;  %v865_v43 = vsub.s32 3, %v3466_v45 }
  0x22   : > { %2676 = vmatprep.subr.mxu1 %v645_v46  ;;  %2642 = vmatpush3.msra.mxu0 %v597_v47  ;;  %v474_v18 = vcombine.low %v452_v10, %v459_v11  ;;  %v540_v19 = vcombine.high %v452_v10, %v459_v11  ;;  %v640_v21 = vld [vmem:[%s5144_s3 + $0x180] sm:$0xff]  ;;  %v687_v30 = vld [vmem:[%s5144_s3 + $0x2f8] sm:$0xff]  ;;  %v702_v56 = vld [vmem:[%s5144_s3 + $0x370] sm:$0xff] }
  0x23   : > { %2677 = vmatpush3.msra.mxu1 %v629_v48  ;;  %2643 = vmatprep.subr.mxu0 %v612_v49  ;;  %v473_v15 = vrot.slane %v433_v7, %v3507_v59  ;;  %v592_v24 = vld [vmem:[%s5144_s3] sm:$0xff]  ;;  %v719_v32 = vld [vmem:[%s5144_s3 + $0x3f8] sm:$0xff]  ;;  %v685_v57 = vld [vmem:[%s5144_s3 + $0x2e8] sm:$0xff] }
  0x24   : > { %2678 = vmatprep.subr.mxu1 %v644_v50  ;;  %2644 = vmatpush3.msra.mxu0 %v596_v51  ;;  %v482_v25 = vrot.slane %v474_v18, %v3507_v59  ;;  %v548_v26 = vrot.slane %v540_v19, %v3507_v59  ;;  %v624_v29 = vld [vmem:[%s5144_s3 + $0x100] sm:$0xff]  ;;  %v671_v51 = vld [vmem:[%s5144_s3 + $0x278] sm:$0xff]  ;;  %v717_v58 = vld [vmem:[%s5144_s3 + $0x3e8] sm:$0xff] }
  0x25   : > { %2679 = vmatpush3.msra.mxu1 %v628_v52  ;;  %2645 = vmatprep.subr.mxu0 %v611_v53  ;;  %v475_v22 = vcombine.low %v466_v14, %v473_v15  ;;  %v541_v23 = vcombine.high %v466_v14, %v473_v15  ;;  %v426_v31 = vld [vmem:[%s5143_s2] sm:$0xff]  ;;  %v703_v52 = vld [vmem:[%s5144_s3 + $0x378] sm:$0xff]  ;;  %v686_v53 = vld [vmem:[%s5144_s3 + $0x2f0] sm:$0xff] }
  0x26   : > { %2680 = vmatprep.subr.mxu1 %v643_v54  ;;  %2646 = vmatpush3.msra.mxu0 %v595_v55  ;;  %v718_v54 = vld [vmem:[%s5144_s3 + $0x3f0] sm:$0xff]  ;;  %v669_v60 = vld [vmem:[%s5144_s3 + $0x268] sm:$0xff]  ;;  %v684_v62 = vld [vmem:[%s5144_s3 + $0x2e0] sm:$0xff] }
  0x27   : > { %2681 = vmatpush3.msra.mxu1 %v627_v63  ;;  %2647 = vmatprep.subr.mxu0 %v610_v4  ;;  %v489_v27 = vrot.slane %v475_v22, %v3507_v59  ;;  %v555_v28 = vrot.slane %v541_v23, %v3507_v59  ;;  %v670_v55 = vld [vmem:[%s5144_s3 + $0x270] sm:$0xff]  ;;  %v701_v61 = vld [vmem:[%s5144_s3 + $0x368] sm:$0xff]  ;;  %v716_v63 = vld [vmem:[%s5144_s3 + $0x3e0] sm:$0xff] }
  0x28   : > { %2682 = vmatprep.subr.mxu1 %v642_v5  ;;  %2648 = vmatpush3.msra.mxu0 %v594_v8  ;;  %v668_v0 = vld [vmem:[%s5144_s3 + $0x260] sm:$0xff]  ;;  %v683_v2 = vld [vmem:[%s5144_s3 + $0x2d8] sm:$0xff]  ;;  %v682_v6 = vld [vmem:[%s5144_s3 + $0x2d0] sm:$0xff] }
  0x29   : > { %2683 = vmatpush3.msra.mxu1 %v626_v9  ;;  %2649 = vmatprep.subr.mxu0 %v609_v12  ;;  %v490_v33 = vcombine.low %v482_v25, %v489_v27  ;;  %v556_v34 = vcombine.low %v548_v26, %v555_v28  ;;  %v578_v36 = vcombine.high %v482_v25, %v489_v27  ;;  %v700_v1 = vld [vmem:[%s5144_s3 + $0x360] sm:$0xff]  ;;  %v715_v3 = vld [vmem:[%s5144_s3 + $0x3d8] sm:$0xff]  ;;  %v714_v7 = vld [vmem:[%s5144_s3 + $0x3d0] sm:$0xff] }
  0x2a   : > { %2684 = vmatprep.subr.mxu1 %v641_v13  ;;  %2650 = vmatpush3.msra.mxu0 %v593_v16  ;;  %v584_v38 = vcombine.high %v548_v26, %v555_v28  ;;  %v667_v4 = vld [vmem:[%s5144_s3 + $0x258] sm:$0xff]  ;;  %v666_v8 = vld [vmem:[%s5144_s3 + $0x250] sm:$0xff]  ;;  %v681_v10 = vld [vmem:[%s5144_s3 + $0x2c8] sm:$0xff] }
  0x2b   : > { %2685 = vmatpush3.msra.mxu1 %v625_v17  ;;  %2651 = vmatprep.subr.mxu0 %v608_v20  ;;  %v538_v35 = vadd.f32 %v490_v33, %v426_v31  ;;  %v699_v5 = vld [vmem:[%s5144_s3 + $0x358] sm:$0xff]  ;;  %v698_v9 = vld [vmem:[%s5144_s3 + $0x350] sm:$0xff]  ;;  %v713_v11 = vld [vmem:[%s5144_s3 + $0x3c8] sm:$0xff] }
  0x2c   : > { %2686 = vmatprep.subr.mxu1 %v640_v21  ;;  %2652 = vmatpush3.msra.mxu0 %v592_v24  ;;  %v665_v12 = vld [vmem:[%s5144_s3 + $0x248] sm:$0xff]  ;;  %v680_v14 = vld [vmem:[%s5144_s3 + $0x2c0] sm:$0xff]  ;;  %v679_v18 = vld [vmem:[%s5144_s3 + $0x2b8] sm:$0xff] }
  0x2d   : > { %2687 = vmatpush3.msra.mxu1 %v624_v29  ;;  %2691 = vmatprep.subr.mxu0 %v687_v30  ;;  %v576_v37 = vadd.f32 %v556_v34, %v538_v35  ;;  %v697_v13 = vld [vmem:[%s5144_s3 + $0x348] sm:$0xff]  ;;  %v712_v15 = vld [vmem:[%s5144_s3 + $0x3c0] sm:$0xff]  ;;  %v711_v19 = vld [vmem:[%s5144_s3 + $0x3b8] sm:$0xff] }
  0x2e   : > { %2726 = vmatprep.subr.mxu1 %v719_v32  ;;  %v664_v16 = vld [vmem:[%s5144_s3 + $0x240] sm:$0xff]  ;;  %v663_v20 = vld [vmem:[%s5144_s3 + $0x238] sm:$0xff]  ;;  %v678_v22 = vld [vmem:[%s5144_s3 + $0x2b0] sm:$0xff] }
  0x2f   : > { %v582_v39 = vadd.f32 %v578_v36, %v576_v37  ;;  %v696_v17 = vld [vmem:[%s5144_s3 + $0x340] sm:$0xff]  ;;  %v695_v21 = vld [vmem:[%s5144_s3 + $0x338] sm:$0xff]  ;;  %v710_v23 = vld [vmem:[%s5144_s3 + $0x3b0] sm:$0xff] }
  0x30   : > { %v662_v24 = vld [vmem:[%s5144_s3 + $0x230] sm:$0xff]  ;;  %v677_v26 = vld [vmem:[%s5144_s3 + $0x2a8] sm:$0xff]  ;;  %v676_v30 = vld [vmem:[%s5144_s3 + $0x2a0] sm:$0xff] }
  0x31   : > { %v588_v41 = vadd.f32 %v584_v38, %v582_v39  ;;  %v694_v25 = vld [vmem:[%s5144_s3 + $0x330] sm:$0xff]  ;;  %v709_v27 = vld [vmem:[%s5144_s3 + $0x3a8] sm:$0xff]  ;;  %v708_v31 = vld [vmem:[%s5144_s3 + $0x3a0] sm:$0xff] }
  0x32   : > { %v661_v28 = vld [vmem:[%s5144_s3 + $0x228] sm:$0xff]  ;;  %v660_v32 = vld [vmem:[%s5144_s3 + $0x220] sm:$0xff]  ;;  %v675_v34 = vld [vmem:[%s5144_s3 + $0x298] sm:$0xff] }
  0x33   : > { %v3582_v46 = vmax.f32 %v588_v41, 0.0  ;;  %v693_v29 = vld [vmem:[%s5144_s3 + $0x328] sm:$0xff]  ;;  %v692_v33 = vld [vmem:[%s5144_s3 + $0x320] sm:$0xff]  ;;  %v707_v35 = vld [vmem:[%s5144_s3 + $0x398] sm:$0xff] }
  0x34   : > { %v414_v36 = vld [vmem:[%s3480_s19 + $0x20] sm:$0xff]  ;;  %v415_v37 = vld [vmem:[%s3480_s19 + $0x28] sm:$0xff]  ;;  %v416_v38 = vld [vmem:[%s3480_s19 + $0x30] sm:$0xff] }
  0x35   : > { %v3587_v47 = vrot.slane %v3582_v46, %v857_v40  ;;  %v3592_v48 = vrot.slane %v3582_v46, %v853_v42  ;;  %v3597_v49 = vrot.slane %v3582_v46, %v865_v43  ;;  %v3602_v50 = vrot.slane %v3582_v46, %v861_v44  ;;  %v417_v39 = vld [vmem:[%s3480_s19 + $0x38] sm:$0xff]  ;;  %v422_v41 = vld [vmem:[%s5142_s1 + $0x20] sm:$0xff]  ;;  %s3252_s19 = smov 32  }
  0x37   : > { %995 = vmatprep.mubr.f32.mxu0 %v3587_v47  ;;  %1065 = vmatprep.mubr.f32.mxu1 %v3597_v49 }
  0x38   : > { %996 = vmatmul.mubr.f32.vlgmr.msra.gmra.mxu0 %v3592_v48  ;;  %1066 = vmatmul.mubr.f32.vlgmr.msra.gmra.mxu1 %v3602_v50 }
  0x39   : > { %2692 = vmatpush3.msra.mxu0 %v671_v51  ;;  %2727 = vmatpush3.msra.mxu1 %v703_v52  ;;  %v423_v51 = vld [vmem:[%s5142_s1 + $0x28] sm:$0xff]  ;;  %v424_v52 = vld [vmem:[%s5142_s1 + $0x30] sm:$0xff] }
  0x3a   : > { %2693 = vmatprep.subr.mxu0 %v686_v53  ;;  %2728 = vmatprep.subr.mxu1 %v718_v54  ;;  %v659_v53 = vld [vmem:[%s5144_s3 + $0x218] sm:$0xff] }
  0x3b   : > { %2694 = vmatpush3.msra.mxu0 %v670_v55  ;;  %2729 = vmatpush3.msra.mxu1 %v702_v56  ;;  %v691_v54 = vld [vmem:[%s5144_s3 + $0x318] sm:$0xff]  ;;  %v434_v56 = vmul.f32 %v422_v41, %v414_v36  ;;  %v750_v36 = vld [vmem:[%s5144_s3 + $0x4f0] sm:$0xff] }
  0x3c   : > { %2695 = vmatprep.subr.mxu0 %v685_v57  ;;  %2730 = vmatprep.subr.mxu1 %v717_v58  ;;  %v425_v55 = vld [vmem:[%s5142_s1 + $0x38] sm:$0xff]  ;;  %v435_v57 = vmul.f32 %v423_v51, %v415_v37  ;;  %v436_v58 = vmul.f32 %v424_v52, %v416_v38  ;;  %v782_v37 = vld [vmem:[%s5144_s3 + $0x5f0] sm:$0xff]  ;;  %v749_v51 = vld [vmem:[%s5144_s3 + $0x4e8] sm:$0xff] }
  0x3d   : > { %2696 = vmatpush3.msra.mxu0 %v669_v60  ;;  %2731 = vmatpush3.msra.mxu1 %v701_v61  ;;  %v674_v60 = vld [vmem:[%s5144_s3 + $0x290] sm:$0xff]  ;;  %v781_v52 = vld [vmem:[%s5144_s3 + $0x5e8] sm:$0xff] }
  0x3e   : > { %2697 = vmatprep.subr.mxu0 %v684_v62  ;;  %2732 = vmatprep.subr.mxu1 %v716_v63  ;;  %v706_v61 = vld [vmem:[%s5144_s3 + $0x390] sm:$0xff]  ;;  %v873_v62 = vsub.s32 5, %v3466_v45  ;;  %v437_v63 = vmul.f32 %v425_v55, %v417_v39  ;;  %v765_v55 = vld [vmem:[%s5144_s3 + $0x568] sm:$0xff] }
  0x3f   : > { %2698 = vmatpush3.msra.mxu0 %v668_v0  ;;  %2733 = vmatpush3.msra.mxu1 %v700_v1  ;;  %v658_v0 = vld [vmem:[%s5144_s3 + $0x210] sm:$0xff] }
  0x40   : > { %2699 = vmatprep.subr.mxu0 %v683_v2  ;;  %2734 = vmatprep.subr.mxu1 %v715_v3  ;;  %v690_v1 = vld [vmem:[%s5144_s3 + $0x310] sm:$0xff]  ;;  %v869_v2 = vsub.s32 4, %v3466_v45  ;;  %v497_v3 = vrot.slane %v434_v56, %v3507_v59  ;;  %v748_v56 = vld [vmem:[%s5144_s3 + $0x4e0] sm:$0xff] }
  0x41   : > { %2700 = vmatpush3.msra.mxu0 %v667_v4  ;;  %2735 = vmatpush3.msra.mxu1 %v699_v5  ;;  %v504_v4 = vrot.slane %v435_v57, %v3507_v59  ;;  %v511_v5 = vrot.slane %v436_v58, %v3507_v59  ;;  %v734_v39 = vld [vmem:[%s5144_s3 + $0x470] sm:$0xff]  ;;  %v780_v57 = vld [vmem:[%s5144_s3 + $0x5e0] sm:$0xff] }
  0x42   : > { %2701 = vmatprep.subr.mxu0 %v682_v6  ;;  %2736 = vmatprep.subr.mxu1 %v714_v7  ;;  %v673_v6 = vld [vmem:[%s5144_s3 + $0x288] sm:$0xff]  ;;  %v766_v41 = vld [vmem:[%s5144_s3 + $0x570] sm:$0xff] }
  0x43   : > { %2702 = vmatpush3.msra.mxu0 %v666_v8  ;;  %2737 = vmatpush3.msra.mxu1 %v698_v9  ;;  %v705_v7 = vld [vmem:[%s5144_s3 + $0x388] sm:$0xff]  ;;  %v881_v8 = vsub.s32 7, %v3466_v45  ;;  %v518_v9 = vrot.slane %v437_v63, %v3507_v59  ;;  %v747_v63 = vld [vmem:[%s5144_s3 + $0x4d8] sm:$0xff] }
  0x44   : > { %2703 = vmatprep.subr.mxu0 %v681_v10  ;;  %2738 = vmatprep.subr.mxu1 %v713_v11  ;;  %v657_v10 = vld [vmem:[%s5144_s3 + $0x208] sm:$0xff] }
  0x45   : > { %2704 = vmatpush3.msra.mxu0 %v665_v12  ;;  %2739 = vmatpush3.msra.mxu1 %v697_v13  ;;  %v689_v11 = vld [vmem:[%s5144_s3 + $0x308] sm:$0xff]  ;;  %v877_v12 = vsub.s32 6, %v3466_v45  ;;  %v519_v13 = vcombine.low %v497_v3, %v504_v4  ;;  %v775_v45 = vld [vmem:[%s5144_s3 + $0x5b8] sm:$0xff] }
  0x46   : > { %2705 = vmatprep.subr.mxu0 %v680_v14  ;;  %2740 = vmatprep.subr.mxu1 %v712_v15  ;;  %v557_v14 = vcombine.high %v497_v3, %v504_v4  ;;  %v672_v15 = vld [vmem:[%s5144_s3 + $0x280] sm:$0xff]  ;;  %v731_v3 = vld [vmem:[%s5144_s3 + $0x458] sm:$0xff] }
  0x47   : > { %2706 = vmatpush3.msra.mxu0 %v664_v16  ;;  %2741 = vmatpush3.msra.mxu1 %v696_v17  ;;  %v704_v16 = vld [vmem:[%s5144_s3 + $0x380] sm:$0xff]  ;;  %v3815_v17 = vrot.slane %v3582_v46, %v873_v62  ;;  %v763_v4 = vld [vmem:[%s5144_s3 + $0x558] sm:$0xff] }
  0x48   : > { %2707 = vmatprep.subr.mxu0 %v679_v18  ;;  %2742 = vmatprep.subr.mxu1 %v711_v19  ;;  %v520_v18 = vcombine.low %v511_v5, %v518_v9  ;;  %v558_v19 = vcombine.high %v511_v5, %v518_v9  ;;  %v746_v5 = vld [vmem:[%s5144_s3 + $0x4d0] sm:$0xff] }
  0x49   : > { %2708 = vmatpush3.msra.mxu0 %v663_v20  ;;  %2743 = vmatpush3.msra.mxu1 %v695_v21  ;;  %v656_v20 = vld [vmem:[%s5144_s3 + $0x200] sm:$0xff]  ;;  %v3823_v21 = vrot.slane %v3582_v46, %v869_v2  ;;  %v730_v9 = vld [vmem:[%s5144_s3 + $0x450] sm:$0xff] }
  0x4a   : > { %2709 = vmatprep.subr.mxu0 %v678_v22  ;;  %2744 = vmatprep.subr.mxu1 %v710_v23  ;;  %v527_v22 = vrot.slane %v519_v13, %v3507_v59  ;;  %v565_v23 = vrot.slane %v557_v14, %v3507_v59  ;;  %v777_v13 = vld [vmem:[%s5144_s3 + $0x5c8] sm:$0xff] }
  0x4b   : > { %2710 = vmatpush3.msra.mxu0 %v662_v24  ;;  %2745 = vmatpush3.msra.mxu1 %v694_v25  ;;  %v688_v24 = vld [vmem:[%s5144_s3 + $0x300] sm:$0xff]  ;;  %v3833_v25 = vrot.slane %v3582_v46, %v881_v8 }
  0x4c   : > { %2711 = vmatprep.subr.mxu0 %v677_v26  ;;  %2746 = vmatprep.subr.mxu1 %v709_v27  ;;  %v534_v26 = vrot.slane %v520_v18, %v3507_v59  ;;  %v572_v27 = vrot.slane %v558_v19, %v3507_v59  ;;  %v783_v59 = vld [vmem:[%s5144_s3 + $0x5f8] sm:$0xff]  ;;  %v729_v18 = vld [vmem:[%s5144_s3 + $0x448] sm:$0xff] }
  0x4d   : > { %2712 = vmatpush3.msra.mxu0 %v661_v28  ;;  %2747 = vmatpush3.msra.mxu1 %v693_v29  ;;  %v751_v28 = vld [vmem:[%s5144_s3 + $0x4f8] sm:$0xff]  ;;  %v3843_v29 = vrot.slane %v3582_v46, %v877_v12  ;;  %v761_v19 = vld [vmem:[%s5144_s3 + $0x548] sm:$0xff] }
  0x4e   : > { %2713 = vmatprep.subr.mxu0 %v676_v30  ;;  %2748 = vmatprep.subr.mxu1 %v708_v31  ;;  %v427_v30 = vld [vmem:[%s5143_s2 + $0x8] sm:$0xff]  ;;  %v535_v31 = vcombine.low %v527_v22, %v534_v26  ;;  %v735_v46 = vld [vmem:[%s5144_s3 + $0x478] sm:$0xff] }
  0x4f   : > { %2714 = vmatpush3.msra.mxu0 %v660_v32  ;;  %2749 = vmatpush3.msra.mxu1 %v692_v33  ;;  %v573_v32 = vcombine.low %v565_v23, %v572_v27  ;;  %v579_v33 = vcombine.high %v527_v22, %v534_v26  ;;  %v776_v22 = vld [vmem:[%s5144_s3 + $0x5c0] sm:$0xff]  ;;  %v742_v26 = vld [vmem:[%s5144_s3 + $0x4b0] sm:$0xff] }
  0x50   : > { %2715 = vmatprep.subr.mxu0 %v675_v34  ;;  %2750 = vmatprep.subr.mxu1 %v707_v35  ;;  %v767_v34 = vld [vmem:[%s5144_s3 + $0x578] sm:$0xff]  ;;  %v585_v35 = vcombine.high %v565_v23, %v572_v27  ;;  %v539_v38 = vadd.f32 %v535_v31, %v427_v30  ;;  %v760_v23 = vld [vmem:[%s5144_s3 + $0x540] sm:$0xff]  ;;  %v774_v27 = vld [vmem:[%s5144_s3 + $0x5b0] sm:$0xff] }
  0x51   : > { %2716 = vmatpush3.msra.mxu0 %v659_v53  ;;  %2751 = vmatpush3.msra.mxu1 %v691_v54  ;;  %v733_v54 = vld [vmem:[%s5144_s3 + $0x468] sm:$0xff]  ;;  %v758_v30 = vld [vmem:[%s5144_s3 + $0x530] sm:$0xff] }
  0x52   : > { %2717 = vmatprep.subr.mxu0 %v674_v60  ;;  %2752 = vmatprep.subr.mxu1 %v706_v61  ;;  %v577_v53 = vadd.f32 %v573_v32, %v539_v38  ;;  %v732_v60 = vld [vmem:[%s5144_s3 + $0x460] sm:$0xff]  ;;  %v773_v31 = vld [vmem:[%s5144_s3 + $0x5a8] sm:$0xff]  ;;  %v771_v38 = vld [vmem:[%s5144_s3 + $0x598] sm:$0xff] }
  0x53   : > { %2718 = vmatpush3.msra.mxu0 %v658_v0  ;;  %2753 = vmatpush3.msra.mxu1 %v690_v1  ;;  %v764_v61 = vld [vmem:[%s5144_s3 + $0x560] sm:$0xff]  ;;  %v779_v0 = vld [vmem:[%s5144_s3 + $0x5d8] sm:$0xff]  ;;  %v725_v32 = vld [vmem:[%s5144_s3 + $0x428] sm:$0xff] }
  0x54   : > { %2719 = vmatprep.subr.mxu0 %v673_v6  ;;  %2754 = vmatprep.subr.mxu1 %v705_v7  ;;  %v583_v58 = vadd.f32 %v579_v33, %v577_v53  ;;  %v778_v6 = vld [vmem:[%s5144_s3 + $0x5d0] sm:$0xff]  ;;  %v757_v33 = vld [vmem:[%s5144_s3 + $0x528] sm:$0xff] }
  0x55   : > { %2720 = vmatpush3.msra.mxu0 %v657_v10  ;;  %2755 = vmatpush3.msra.mxu1 %v689_v11  ;;  %v762_v10 = vld [vmem:[%s5144_s3 + $0x550] sm:$0xff]  ;;  %v745_v11 = vld [vmem:[%s5144_s3 + $0x4c8] sm:$0xff] }
  0x56   : > { %2721 = vmatprep.subr.mxu0 %v672_v15  ;;  %2756 = vmatprep.subr.mxu1 %v704_v16  ;;  %v589_v1 = vadd.f32 %v585_v35, %v583_v58  ;;  %v724_v35 = vld [vmem:[%s5144_s3 + $0x420] sm:$0xff]  ;;  %v722_v53 = vld [vmem:[%s5144_s3 + $0x410] sm:$0xff]  ;;  %v753_v58 = vld [vmem:[%s5144_s3 + $0x508] sm:$0xff] }
  0x57   : > { %2722 = vmatpush3.msra.mxu0 %v656_v20  ;;  %1135 = vmatprep.mubr.f32.mxu0 %v3815_v17  ;;  %v744_v20 = vld [vmem:[%s5144_s3 + $0x4c0] sm:$0xff] }
  0x58   : > { %2757 = vmatpush3.msra.mxu1 %v688_v24  ;;  %1136 = vmatmul.mubr.f32.vlgmr.msra.gmra.mxu0 %v3823_v21  ;;  %v591_v7 = vmax.f32 %v589_v1, 0.0  ;;  %v759_v24 = vld [vmem:[%s5144_s3 + $0x538] sm:$0xff] }
  0x59   : > { %1205 = vmatprep.mubr.f32.mxu1 %v3833_v25  ;;  %2761 = vmatprep.subr.mxu0 %v751_v28  ;;  %v726_v28 = vld [vmem:[%s5144_s3 + $0x430] sm:$0xff]  ;;  %v815_v1 = vld [vmem:[%s5144_s3 + $0x6f8] sm:$0xff] }
  0x5a   : > { %2796 = vmatprep.subr.mxu1 %v783_v59  ;;  %1206 = vmatmul.mubr.f32.vlgmr.msra.gmra.mxu1 %v3843_v29  ;;  %v3929_v14 = vrot.slane %v591_v7, %v857_v40  ;;  %v3933_v15 = vrot.slane %v591_v7, %v853_v42  ;;  %v3937_v16 = vrot.slane %v591_v7, %v865_v43  ;;  %v741_v59 = vld [vmem:[%s5144_s3 + $0x4a8] sm:$0xff] }
  0x5b   : > { %2762 = vmatpush3.msra.mxu0 %v735_v46  ;;  %2797 = vmatpush3.msra.mxu1 %v767_v34  ;;  %v3947_v40 = vrot.slane %v591_v7, %v861_v44  ;;  %v3951_v42 = vrot.slane %v591_v7, %v873_v62  ;;  %v3955_v43 = vrot.slane %v591_v7, %v869_v2  ;;  %v728_v2 = vld [vmem:[%s5144_s3 + $0x440] sm:$0xff] }
  0x5c   : > { %2763 = vmatprep.subr.mxu0 %v750_v36  ;;  %2798 = vmatprep.subr.mxu1 %v782_v37  ;;  %v3965_v44 = vrot.slane %v591_v7, %v881_v8  ;;  %v3969_v62 = vrot.slane %v591_v7, %v877_v12  ;;  %v743_v8 = vld [vmem:[%s5144_s3 + $0x4b8] sm:$0xff]  ;;  %v740_v46 = vld [vmem:[%s5144_s3 + $0x4a0] sm:$0xff]  ;;  %v846_v7 = vld [vmem:[%s5144_s3 + $0x7f0] sm:$0xff] }
  0x5d   : > { %2764 = vmatpush3.msra.mxu0 %v734_v39  ;;  %2799 = vmatpush3.msra.mxu1 %v766_v41  ;;  %v727_v12 = vld [vmem:[%s5144_s3 + $0x438] sm:$0xff]  ;;  %v772_v34 = vld [vmem:[%s5144_s3 + $0x5a0] sm:$0xff] }
  0x5e   : > { %2765 = vmatprep.subr.mxu0 %v749_v51  ;;  %2800 = vmatprep.subr.mxu1 %v781_v52  ;;  %v756_v36 = vld [vmem:[%s5144_s3 + $0x520] sm:$0xff]  ;;  %v739_v37 = vld [vmem:[%s5144_s3 + $0x498] sm:$0xff]  ;;  %v738_v51 = vld [vmem:[%s5144_s3 + $0x490] sm:$0xff] }
  0x5f   : > { %2766 = vmatpush3.msra.mxu0 %v733_v54  ;;  %2801 = vmatpush3.msra.mxu1 %v765_v55  ;;  %v723_v39 = vld [vmem:[%s5144_s3 + $0x418] sm:$0xff]  ;;  %v770_v52 = vld [vmem:[%s5144_s3 + $0x590] sm:$0xff]  ;;  %v737_v55 = vld [vmem:[%s5144_s3 + $0x488] sm:$0xff] }
  0x60   : > { %2767 = vmatprep.subr.mxu0 %v748_v56  ;;  %2802 = vmatprep.subr.mxu1 %v780_v57  ;;  %v755_v41 = vld [vmem:[%s5144_s3 + $0x518] sm:$0xff]  ;;  %v754_v54 = vld [vmem:[%s5144_s3 + $0x510] sm:$0xff]  ;;  %v769_v56 = vld [vmem:[%s5144_s3 + $0x588] sm:$0xff] }
  0x61   : > { %2768 = vmatpush3.msra.mxu0 %v732_v60  ;;  %2803 = vmatpush3.msra.mxu1 %v764_v61  ;;  %v721_v57 = vld [vmem:[%s5144_s3 + $0x408] sm:$0xff]  ;;  %v736_v60 = vld [vmem:[%s5144_s3 + $0x480] sm:$0xff] }
  0x62   : > { %2769 = vmatprep.subr.mxu0 %v747_v63  ;;  %2804 = vmatprep.subr.mxu1 %v779_v0  ;;  %v768_v61 = vld [vmem:[%s5144_s3 + $0x580] sm:$0xff] }
  0x63   : > { %2770 = vmatpush3.msra.mxu0 %v731_v3  ;;  %2805 = vmatpush3.msra.mxu1 %v763_v4  ;;  %v720_v63 = vld [vmem:[%s5144_s3 + $0x400] sm:$0xff]  ;;  %v847_v3 = vld [vmem:[%s5144_s3 + $0x7f8] sm:$0xff] }
  0x64   : > { %2771 = vmatprep.subr.mxu0 %v746_v5  ;;  %2806 = vmatprep.subr.mxu1 %v778_v6  ;;  %v752_v0 = vld [vmem:[%s5144_s3 + $0x500] sm:$0xff]  ;;  %v799_v4 = vld [vmem:[%s5144_s3 + $0x678] sm:$0xff]  ;;  %v814_v6 = vld [vmem:[%s5144_s3 + $0x6f0] sm:$0xff] }
  0x65   : > { %2772 = vmatpush3.msra.mxu0 %v730_v9  ;;  %2807 = vmatpush3.msra.mxu1 %v762_v10  ;;  %v831_v5 = vld [vmem:[%s5144_s3 + $0x778] sm:$0xff]  ;;  %v798_v9 = vld [vmem:[%s5144_s3 + $0x670] sm:$0xff] }
  0x66   : > { %2773 = vmatprep.subr.mxu0 %v745_v11  ;;  %2808 = vmatprep.subr.mxu1 %v777_v13  ;;  %v830_v10 = vld [vmem:[%s5144_s3 + $0x770] sm:$0xff]  ;;  %v813_v11 = vld [vmem:[%s5144_s3 + $0x6e8] sm:$0xff] }
  0x67   : > { %2774 = vmatpush3.msra.mxu0 %v729_v18  ;;  %2809 = vmatpush3.msra.mxu1 %v761_v19  ;;  %v845_v13 = vld [vmem:[%s5144_s3 + $0x7e8] sm:$0xff] }
  0x68   : > { %2775 = vmatprep.subr.mxu0 %v744_v20  ;;  %2810 = vmatprep.subr.mxu1 %v776_v22  ;;  %v797_v18 = vld [vmem:[%s5144_s3 + $0x668] sm:$0xff]  ;;  %v812_v20 = vld [vmem:[%s5144_s3 + $0x6e0] sm:$0xff] }
  0x69   : > { %2776 = vmatpush3.msra.mxu0 %v728_v2  ;;  %2811 = vmatpush3.msra.mxu1 %v760_v23  ;;  %v829_v19 = vld [vmem:[%s5144_s3 + $0x768] sm:$0xff]  ;;  %v844_v22 = vld [vmem:[%s5144_s3 + $0x7e0] sm:$0xff] }
  0x6a   : > { %2777 = vmatprep.subr.mxu0 %v743_v8  ;;  %2812 = vmatprep.subr.mxu1 %v775_v45  ;;  %v796_v2 = vld [vmem:[%s5144_s3 + $0x660] sm:$0xff]  ;;  %v811_v8 = vld [vmem:[%s5144_s3 + $0x6d8] sm:$0xff] }
  0x6b   : > { %2778 = vmatpush3.msra.mxu0 %v727_v12  ;;  %2813 = vmatpush3.msra.mxu1 %v759_v24  ;;  %v828_v23 = vld [vmem:[%s5144_s3 + $0x760] sm:$0xff]  ;;  %v843_v45 = vld [vmem:[%s5144_s3 + $0x7d8] sm:$0xff] }
  0x6c   : > { %2779 = vmatprep.subr.mxu0 %v742_v26  ;;  %2814 = vmatprep.subr.mxu1 %v774_v27  ;;  %v795_v12 = vld [vmem:[%s5144_s3 + $0x658] sm:$0xff]  ;;  %v810_v26 = vld [vmem:[%s5144_s3 + $0x6d0] sm:$0xff] }
  0x6d   : > { %2780 = vmatpush3.msra.mxu0 %v726_v28  ;;  %2815 = vmatpush3.msra.mxu1 %v758_v30  ;;  %v827_v24 = vld [vmem:[%s5144_s3 + $0x758] sm:$0xff]  ;;  %v842_v27 = vld [vmem:[%s5144_s3 + $0x7d0] sm:$0xff] }
  0x6e   : > { %2781 = vmatprep.subr.mxu0 %v741_v59  ;;  %2816 = vmatprep.subr.mxu1 %v773_v31  ;;  %v794_v28 = vld [vmem:[%s5144_s3 + $0x650] sm:$0xff]  ;;  %v809_v59 = vld [vmem:[%s5144_s3 + $0x6c8] sm:$0xff] }
  0x6f   : > { %2782 = vmatpush3.msra.mxu0 %v725_v32  ;;  %2817 = vmatpush3.msra.mxu1 %v757_v33  ;;  %v826_v30 = vld [vmem:[%s5144_s3 + $0x750] sm:$0xff]  ;;  %v841_v31 = vld [vmem:[%s5144_s3 + $0x7c8] sm:$0xff] }
  0x70   : > { %2783 = vmatprep.subr.mxu0 %v740_v46  ;;  %2818 = vmatprep.subr.mxu1 %v772_v34  ;;  %v793_v32 = vld [vmem:[%s5144_s3 + $0x648] sm:$0xff]  ;;  %v808_v46 = vld [vmem:[%s5144_s3 + $0x6c0] sm:$0xff] }
  0x71   : > { %2784 = vmatpush3.msra.mxu0 %v724_v35  ;;  %2819 = vmatpush3.msra.mxu1 %v756_v36  ;;  %v825_v33 = vld [vmem:[%s5144_s3 + $0x748] sm:$0xff]  ;;  %v840_v34 = vld [vmem:[%s5144_s3 + $0x7c0] sm:$0xff] }
  0x72   : > { %2785 = vmatprep.subr.mxu0 %v739_v37  ;;  %2820 = vmatprep.subr.mxu1 %v771_v38  ;;  %v792_v35 = vld [vmem:[%s5144_s3 + $0x640] sm:$0xff]  ;;  %v807_v37 = vld [vmem:[%s5144_s3 + $0x6b8] sm:$0xff] }
  0x73   : > { %2786 = vmatpush3.msra.mxu0 %v723_v39  ;;  %2821 = vmatpush3.msra.mxu1 %v755_v41  ;;  %v824_v36 = vld [vmem:[%s5144_s3 + $0x740] sm:$0xff]  ;;  %v839_v38 = vld [vmem:[%s5144_s3 + $0x7b8] sm:$0xff] }
  0x74   : > { %2787 = vmatprep.subr.mxu0 %v738_v51  ;;  %2822 = vmatprep.subr.mxu1 %v770_v52  ;;  %v791_v39 = vld [vmem:[%s5144_s3 + $0x638] sm:$0xff]  ;;  %v806_v51 = vld [vmem:[%s5144_s3 + $0x6b0] sm:$0xff] }
  0x75   : > { %2788 = vmatpush3.msra.mxu0 %v722_v53  ;;  %2823 = vmatpush3.msra.mxu1 %v754_v54  ;;  %v823_v41 = vld [vmem:[%s5144_s3 + $0x738] sm:$0xff]  ;;  %v838_v52 = vld [vmem:[%s5144_s3 + $0x7b0] sm:$0xff] }
  0x76   : > { %2789 = vmatprep.subr.mxu0 %v737_v55  ;;  %2824 = vmatprep.subr.mxu1 %v769_v56  ;;  %v790_v53 = vld [vmem:[%s5144_s3 + $0x630] sm:$0xff]  ;;  %v805_v55 = vld [vmem:[%s5144_s3 + $0x6a8] sm:$0xff] }
  0x77   : > { %2790 = vmatpush3.msra.mxu0 %v721_v57  ;;  %2825 = vmatpush3.msra.mxu1 %v753_v58  ;;  %v822_v54 = vld [vmem:[%s5144_s3 + $0x730] sm:$0xff]  ;;  %v837_v56 = vld [vmem:[%s5144_s3 + $0x7a8] sm:$0xff] }
  0x78   : > { %2791 = vmatprep.subr.mxu0 %v736_v60  ;;  %2826 = vmatprep.subr.mxu1 %v768_v61  ;;  %v789_v57 = vld [vmem:[%s5144_s3 + $0x628] sm:$0xff]  ;;  %v804_v60 = vld [vmem:[%s5144_s3 + $0x6a0] sm:$0xff] }
  0x79   : > { %2792 = vmatpush3.msra.mxu0 %v720_v63  ;;  %1275 = vmatprep.mubr.f32.mxu0 %v3929_v14  ;;  %v821_v58 = vld [vmem:[%s5144_s3 + $0x728] sm:$0xff]  ;;  %v836_v61 = vld [vmem:[%s5144_s3 + $0x7a0] sm:$0xff] }
  0x7a   : > { %2827 = vmatpush3.msra.mxu1 %v752_v0  ;;  %1276 = vmatmul.mubr.f32.vlgmr.msra.gmra.mxu0 %v3933_v15  ;;  %v788_v63 = vld [vmem:[%s5144_s3 + $0x620] sm:$0xff] }
  0x7b   : > { %1345 = vmatprep.mubr.f32.mxu1 %v3937_v16  ;;  %2831 = vmatprep.subr.mxu0 %v815_v1  ;;  %v820_v0 = vld [vmem:[%s5144_s3 + $0x720] sm:$0xff]  ;;  %v803_v1 = vld [vmem:[%s5144_s3 + $0x698] sm:$0xff] }
  0x7c   : > { %2866 = vmatprep.subr.mxu1 %v847_v3  ;;  %1346 = vmatmul.mubr.f32.vlgmr.msra.gmra.mxu1 %v3947_v40  ;;  %v835_v3 = vld [vmem:[%s5144_s3 + $0x798] sm:$0xff] }
  0x7d   : > { %2832 = vmatpush3.msra.mxu0 %v799_v4  ;;  %2867 = vmatpush3.msra.mxu1 %v831_v5  ;;  %v787_v4 = vld [vmem:[%s5144_s3 + $0x618] sm:$0xff] }
  0x7e   : > { %2833 = vmatprep.subr.mxu0 %v814_v6  ;;  %2868 = vmatprep.subr.mxu1 %v846_v7  ;;  %v819_v5 = vld [vmem:[%s5144_s3 + $0x718] sm:$0xff]  ;;  %v802_v6 = vld [vmem:[%s5144_s3 + $0x690] sm:$0xff] }
  0x7f   : > { %2834 = vmatpush3.msra.mxu0 %v798_v9  ;;  %2869 = vmatpush3.msra.mxu1 %v830_v10  ;;  %v834_v7 = vld [vmem:[%s5144_s3 + $0x790] sm:$0xff] }
  0x80   : > { %2835 = vmatprep.subr.mxu0 %v813_v11  ;;  %2870 = vmatprep.subr.mxu1 %v845_v13  ;;  %v786_v9 = vld [vmem:[%s5144_s3 + $0x610] sm:$0xff]  ;;  %v801_v11 = vld [vmem:[%s5144_s3 + $0x688] sm:$0xff] }
  0x81   : > { %2836 = vmatpush3.msra.mxu0 %v797_v18  ;;  %2871 = vmatpush3.msra.mxu1 %v829_v19  ;;  %v818_v10 = vld [vmem:[%s5144_s3 + $0x710] sm:$0xff]  ;;  %v833_v13 = vld [vmem:[%s5144_s3 + $0x788] sm:$0xff] }
  0x82   : > { %2837 = vmatprep.subr.mxu0 %v812_v20  ;;  %2872 = vmatprep.subr.mxu1 %v844_v22  ;;  %v785_v18 = vld [vmem:[%s5144_s3 + $0x608] sm:$0xff]  ;;  %v800_v20 = vld [vmem:[%s5144_s3 + $0x680] sm:$0xff] }
  0x83   : > { %2838 = vmatpush3.msra.mxu0 %v796_v2  ;;  %2873 = vmatpush3.msra.mxu1 %v828_v23  ;;  %v817_v19 = vld [vmem:[%s5144_s3 + $0x708] sm:$0xff]  ;;  %v832_v22 = vld [vmem:[%s5144_s3 + $0x780] sm:$0xff] }
  0x84   : > { %2839 = vmatprep.subr.mxu0 %v811_v8  ;;  %2874 = vmatprep.subr.mxu1 %v843_v45  ;;  %v784_v2 = vld [vmem:[%s5144_s3 + $0x600] sm:$0xff]  ;;  %v1522_v8 = vld [vmem:[%s5146_s5 + $0xf8] sm:$0xff] }
  0x85   : > { %2840 = vmatpush3.msra.mxu0 %v795_v12  ;;  %2875 = vmatpush3.msra.mxu1 %v827_v24  ;;  %v816_v23 = vld [vmem:[%s5144_s3 + $0x700] sm:$0xff]  ;;  %v1554_v45 = vld [vmem:[%s5146_s5 + $0x1f8] sm:$0xff] }
  0x86   : > { %2841 = vmatprep.subr.mxu0 %v810_v26  ;;  %2876 = vmatprep.subr.mxu1 %v842_v27  ;;  %v1506_v12 = vld [vmem:[%s5146_s5 + $0x78] sm:$0xff]  ;;  %v1521_v26 = vld [vmem:[%s5146_s5 + $0xf0] sm:$0xff] }
  0x87   : > { %2842 = vmatpush3.msra.mxu0 %v794_v28  ;;  %2877 = vmatpush3.msra.mxu1 %v826_v30  ;;  %v1538_v24 = vld [vmem:[%s5146_s5 + $0x178] sm:$0xff]  ;;  %v1553_v27 = vld [vmem:[%s5146_s5 + $0x1f0] sm:$0xff] }
  0x88   : > { %2843 = vmatprep.subr.mxu0 %v809_v59  ;;  %2878 = vmatprep.subr.mxu1 %v841_v31  ;;  %v1505_v28 = vld [vmem:[%s5146_s5 + $0x70] sm:$0xff]  ;;  %v1520_v59 = vld [vmem:[%s5146_s5 + $0xe8] sm:$0xff] }
  0x89   : > { %2844 = vmatpush3.msra.mxu0 %v793_v32  ;;  %2879 = vmatpush3.msra.mxu1 %v825_v33  ;;  %v1537_v30 = vld [vmem:[%s5146_s5 + $0x170] sm:$0xff]  ;;  %v1552_v31 = vld [vmem:[%s5146_s5 + $0x1e8] sm:$0xff] }
  0x8a   : > { %2845 = vmatprep.subr.mxu0 %v808_v46  ;;  %2880 = vmatprep.subr.mxu1 %v840_v34  ;;  %v1504_v32 = vld [vmem:[%s5146_s5 + $0x68] sm:$0xff]  ;;  %v1519_v46 = vld [vmem:[%s5146_s5 + $0xe0] sm:$0xff] }
  0x8b   : > { %2846 = vmatpush3.msra.mxu0 %v792_v35  ;;  %2881 = vmatpush3.msra.mxu1 %v824_v36  ;;  %v1536_v33 = vld [vmem:[%s5146_s5 + $0x168] sm:$0xff]  ;;  %v1551_v34 = vld [vmem:[%s5146_s5 + $0x1e0] sm:$0xff] }
  0x8c   : > { %2847 = vmatprep.subr.mxu0 %v807_v37  ;;  %2882 = vmatprep.subr.mxu1 %v839_v38  ;;  %v1503_v35 = vld [vmem:[%s5146_s5 + $0x60] sm:$0xff]  ;;  %v1518_v37 = vld [vmem:[%s5146_s5 + $0xd8] sm:$0xff] }
  0x8d   : > { %2848 = vmatpush3.msra.mxu0 %v791_v39  ;;  %2883 = vmatpush3.msra.mxu1 %v823_v41  ;;  %v1535_v36 = vld [vmem:[%s5146_s5 + $0x160] sm:$0xff]  ;;  %v1550_v38 = vld [vmem:[%s5146_s5 + $0x1d8] sm:$0xff] }
  0x8e   : > { %2849 = vmatprep.subr.mxu0 %v806_v51  ;;  %2884 = vmatprep.subr.mxu1 %v838_v52  ;;  %v1502_v39 = vld [vmem:[%s5146_s5 + $0x58] sm:$0xff]  ;;  %v1517_v51 = vld [vmem:[%s5146_s5 + $0xd0] sm:$0xff] }
  0x8f   : > { %2850 = vmatpush3.msra.mxu0 %v790_v53  ;;  %2885 = vmatpush3.msra.mxu1 %v822_v54  ;;  %v1534_v41 = vld [vmem:[%s5146_s5 + $0x158] sm:$0xff]  ;;  %v1549_v52 = vld [vmem:[%s5146_s5 + $0x1d0] sm:$0xff] }
  0x90   : > { %2851 = vmatprep.subr.mxu0 %v805_v55  ;;  %2886 = vmatprep.subr.mxu1 %v837_v56  ;;  %v1501_v53 = vld [vmem:[%s5146_s5 + $0x50] sm:$0xff]  ;;  %v1516_v55 = vld [vmem:[%s5146_s5 + $0xc8] sm:$0xff] }
  0x91   : > { %2852 = vmatpush3.msra.mxu0 %v789_v57  ;;  %2887 = vmatpush3.msra.mxu1 %v821_v58  ;;  %v1533_v54 = vld [vmem:[%s5146_s5 + $0x150] sm:$0xff]  ;;  %v1548_v56 = vld [vmem:[%s5146_s5 + $0x1c8] sm:$0xff] }
  0x92   : > { %2853 = vmatprep.subr.mxu0 %v804_v60  ;;  %2888 = vmatprep.subr.mxu1 %v836_v61  ;;  %v1500_v57 = vld [vmem:[%s5146_s5 + $0x48] sm:$0xff]  ;;  %v1515_v60 = vld [vmem:[%s5146_s5 + $0xc0] sm:$0xff] }
  0x93   : > { %2854 = vmatpush3.msra.mxu0 %v788_v63  ;;  %2889 = vmatpush3.msra.mxu1 %v820_v0  ;;  %v1532_v58 = vld [vmem:[%s5146_s5 + $0x148] sm:$0xff]  ;;  %v1547_v61 = vld [vmem:[%s5146_s5 + $0x1c0] sm:$0xff] }
  0x94   : > { %2855 = vmatprep.subr.mxu0 %v803_v1  ;;  %2890 = vmatprep.subr.mxu1 %v835_v3  ;;  %v1499_v63 = vld [vmem:[%s5146_s5 + $0x40] sm:$0xff]  ;;  %v1514_v1 = vld [vmem:[%s5146_s5 + $0xb8] sm:$0xff] }
  0x95   : > { %2856 = vmatpush3.msra.mxu0 %v787_v4  ;;  %2891 = vmatpush3.msra.mxu1 %v819_v5  ;;  %v1531_v0 = vld [vmem:[%s5146_s5 + $0x140] sm:$0xff]  ;;  %v1546_v3 = vld [vmem:[%s5146_s5 + $0x1b8] sm:$0xff] }
  0x96   : > { %2857 = vmatprep.subr.mxu0 %v802_v6  ;;  %2892 = vmatprep.subr.mxu1 %v834_v7  ;;  %v1498_v4 = vld [vmem:[%s5146_s5 + $0x38] sm:$0xff]  ;;  %v1513_v6 = vld [vmem:[%s5146_s5 + $0xb0] sm:$0xff] }
  0x97   : > { %2858 = vmatpush3.msra.mxu0 %v786_v9  ;;  %2893 = vmatpush3.msra.mxu1 %v818_v10  ;;  %v1530_v5 = vld [vmem:[%s5146_s5 + $0x138] sm:$0xff]  ;;  %v1545_v7 = vld [vmem:[%s5146_s5 + $0x1b0] sm:$0xff] }
  0x98   : > { %2859 = vmatprep.subr.mxu0 %v801_v11  ;;  %2894 = vmatprep.subr.mxu1 %v833_v13  ;;  %v1497_v9 = vld [vmem:[%s5146_s5 + $0x30] sm:$0xff]  ;;  %v1512_v11 = vld [vmem:[%s5146_s5 + $0xa8] sm:$0xff] }
  0x99   : > { %2860 = vmatpush3.msra.mxu0 %v785_v18  ;;  %2895 = vmatpush3.msra.mxu1 %v817_v19  ;;  %v1529_v10 = vld [vmem:[%s5146_s5 + $0x130] sm:$0xff]  ;;  %v1544_v13 = vld [vmem:[%s5146_s5 + $0x1a8] sm:$0xff] }
  0x9a   : > { %2861 = vmatprep.subr.mxu0 %v800_v20  ;;  %2896 = vmatprep.subr.mxu1 %v832_v22  ;;  %v1496_v18 = vld [vmem:[%s5146_s5 + $0x28] sm:$0xff]  ;;  %v1511_v20 = vld [vmem:[%s5146_s5 + $0xa0] sm:$0xff] }
  0x9b   : > { %2862 = vmatpush3.msra.mxu0 %v784_v2  ;;  %1415 = vmatprep.mubr.f32.mxu0 %v3951_v42  ;;  %v1528_v19 = vld [vmem:[%s5146_s5 + $0x128] sm:$0xff]  ;;  %v1543_v22 = vld [vmem:[%s5146_s5 + $0x1a0] sm:$0xff] }
  0x9c   : > { %2897 = vmatpush3.msra.mxu1 %v816_v23  ;;  %1416 = vmatmul.mubr.f32.vlgmr.msra.gmra.mxu0 %v3955_v43  ;;  %v1495_v2 = vld [vmem:[%s5146_s5 + $0x20] sm:$0xff] }
  0x9d   : > { %1485 = vmatprep.mubr.f32.mxu1 %v3965_v44  ;;  %2901 = vmatprep.subr.mxu0 %v1522_v8  ;;  %v1527_v23 = vld [vmem:[%s5146_s5 + $0x120] sm:$0xff]  ;;  %v1510_v8 = vld [vmem:[%s5146_s5 + $0x98] sm:$0xff] }
  0x9e   : > { %2936 = vmatprep.subr.mxu1 %v1554_v45  ;;  %1486 = vmatmul.mubr.f32.vlgmr.msra.gmra.mxu1 %v3969_v62  ;;  %v1542_v45 = vld [vmem:[%s5146_s5 + $0x198] sm:$0xff] }
  0x9f   : > { %2902 = vmatpush3.msra.mxu0 %v1506_v12  ;;  %2937 = vmatpush3.msra.mxu1 %v1538_v24  ;;  %v1494_v12 = vld [vmem:[%s5146_s5 + $0x18] sm:$0xff] }
  0xa0   : > { %2903 = vmatprep.subr.mxu0 %v1521_v26  ;;  %2938 = vmatprep.subr.mxu1 %v1553_v27  ;;  %v1526_v24 = vld [vmem:[%s5146_s5 + $0x118] sm:$0xff]  ;;  %v1509_v26 = vld [vmem:[%s5146_s5 + $0x90] sm:$0xff] }
  0xa1   : > { %2904 = vmatpush3.msra.mxu0 %v1505_v28  ;;  %2939 = vmatpush3.msra.mxu1 %v1537_v30  ;;  %v1541_v27 = vld [vmem:[%s5146_s5 + $0x190] sm:$0xff] }
  0xa2   : > { %2905 = vmatprep.subr.mxu0 %v1520_v59  ;;  %2940 = vmatprep.subr.mxu1 %v1552_v31  ;;  %v1493_v28 = vld [vmem:[%s5146_s5 + $0x10] sm:$0xff]  ;;  %v1508_v59 = vld [vmem:[%s5146_s5 + $0x88] sm:$0xff] }
  0xa3   : > { %2906 = vmatpush3.msra.mxu0 %v1504_v32  ;;  %2941 = vmatpush3.msra.mxu1 %v1536_v33  ;;  %v1525_v30 = vld [vmem:[%s5146_s5 + $0x110] sm:$0xff]  ;;  %v1540_v31 = vld [vmem:[%s5146_s5 + $0x188] sm:$0xff] }
  0xa4   : > { %2907 = vmatprep.subr.mxu0 %v1519_v46  ;;  %2942 = vmatprep.subr.mxu1 %v1551_v34  ;;  %v1492_v32 = vld [vmem:[%s5146_s5 + $0x8] sm:$0xff]  ;;  %v1507_v46 = vld [vmem:[%s5146_s5 + $0x80] sm:$0xff] }
  0xa5   : > { %2908 = vmatpush3.msra.mxu0 %v1503_v35  ;;  %2943 = vmatpush3.msra.mxu1 %v1535_v36  ;;  %v1524_v33 = vld [vmem:[%s5146_s5 + $0x108] sm:$0xff]  ;;  %v1539_v34 = vld [vmem:[%s5146_s5 + $0x180] sm:$0xff] }
  0xa6   : > { %2909 = vmatprep.subr.mxu0 %v1518_v37  ;;  %2944 = vmatprep.subr.mxu1 %v1550_v38  ;;  %v1491_v35 = vld [vmem:[%s5146_s5] sm:$0xff]  ;;  %v1586_v37 = vld [vmem:[%s5146_s5 + $0x2f8] sm:$0xff] }
  0xa7   : > { %2910 = vmatpush3.msra.mxu0 %v1502_v39  ;;  %2945 = vmatpush3.msra.mxu1 %v1534_v41  ;;  %v1523_v36 = vld [vmem:[%s5146_s5 + $0x100] sm:$0xff]  ;;  %v1618_v38 = vld [vmem:[%s5146_s5 + $0x3f8] sm:$0xff] }
  0xa8   : > { %2911 = vmatprep.subr.mxu0 %v1517_v51  ;;  %2946 = vmatprep.subr.mxu1 %v1549_v52  ;;  %v1570_v39 = vld [vmem:[%s5146_s5 + $0x278] sm:$0xff]  ;;  %v1569_v51 = vld [vmem:[%s5146_s5 + $0x270] sm:$0xff]  ;;  %v1616_v52 = vld [vmem:[%s5146_s5 + $0x3e8] sm:$0xff] }
  0xa9   : > { %2912 = vmatpush3.msra.mxu0 %v1501_v53  ;;  %2947 = vmatpush3.msra.mxu1 %v1533_v54  ;;  %v1602_v41 = vld [vmem:[%s5146_s5 + $0x378] sm:$0xff]  ;;  %v1568_v53 = vld [vmem:[%s5146_s5 + $0x268] sm:$0xff] }
  0xaa   : > { %2913 = vmatprep.subr.mxu0 %v1516_v55  ;;  %2948 = vmatprep.subr.mxu1 %v1548_v56  ;;  %v1600_v54 = vld [vmem:[%s5146_s5 + $0x368] sm:$0xff]  ;;  %v1583_v55 = vld [vmem:[%s5146_s5 + $0x2e0] sm:$0xff] }
  0xab   : > { %2914 = vmatpush3.msra.mxu0 %v1500_v57  ;;  %2949 = vmatpush3.msra.mxu1 %v1532_v58  ;;  %v1615_v56 = vld [vmem:[%s5146_s5 + $0x3e0] sm:$0xff] }
  0xac   : > { %2915 = vmatprep.subr.mxu0 %v1515_v60  ;;  %2950 = vmatprep.subr.mxu1 %v1547_v61  ;;  %v1567_v57 = vld [vmem:[%s5146_s5 + $0x260] sm:$0xff]  ;;  %v1582_v60 = vld [vmem:[%s5146_s5 + $0x2d8] sm:$0xff] }
  0xad   : > { %2916 = vmatpush3.msra.mxu0 %v1499_v63  ;;  %2951 = vmatpush3.msra.mxu1 %v1531_v0  ;;  %v1599_v58 = vld [vmem:[%s5146_s5 + $0x360] sm:$0xff]  ;;  %v1614_v61 = vld [vmem:[%s5146_s5 + $0x3d8] sm:$0xff] }
  0xae   : > { %2917 = vmatprep.subr.mxu0 %v1514_v1  ;;  %2952 = vmatprep.subr.mxu1 %v1546_v3  ;;  %v1566_v63 = vld [vmem:[%s5146_s5 + $0x258] sm:$0xff]  ;;  %v1581_v1 = vld [vmem:[%s5146_s5 + $0x2d0] sm:$0xff] }
  0xaf   : > { %2918 = vmatpush3.msra.mxu0 %v1498_v4  ;;  %2953 = vmatpush3.msra.mxu1 %v1530_v5  ;;  %v1598_v0 = vld [vmem:[%s5146_s5 + $0x358] sm:$0xff]  ;;  %v1613_v3 = vld [vmem:[%s5146_s5 + $0x3d0] sm:$0xff] }
  0xb0   : > { %2919 = vmatprep.subr.mxu0 %v1513_v6  ;;  %2954 = vmatprep.subr.mxu1 %v1545_v7  ;;  %v1565_v4 = vld [vmem:[%s5146_s5 + $0x250] sm:$0xff]  ;;  %v1580_v6 = vld [vmem:[%s5146_s5 + $0x2c8] sm:$0xff] }
  0xb1   : > { %2920 = vmatpush3.msra.mxu0 %v1497_v9  ;;  %2955 = vmatpush3.msra.mxu1 %v1529_v10  ;;  %v1597_v5 = vld [vmem:[%s5146_s5 + $0x350] sm:$0xff]  ;;  %v1612_v7 = vld [vmem:[%s5146_s5 + $0x3c8] sm:$0xff] }
  0xb2   : > { %2921 = vmatprep.subr.mxu0 %v1512_v11  ;;  %2956 = vmatprep.subr.mxu1 %v1544_v13  ;;  %v1564_v9 = vld [vmem:[%s5146_s5 + $0x248] sm:$0xff]  ;;  %v1579_v11 = vld [vmem:[%s5146_s5 + $0x2c0] sm:$0xff] }
  0xb3   : > { %2922 = vmatpush3.msra.mxu0 %v1496_v18  ;;  %2957 = vmatpush3.msra.mxu1 %v1528_v19  ;;  %v1596_v10 = vld [vmem:[%s5146_s5 + $0x348] sm:$0xff]  ;;  %v1611_v13 = vld [vmem:[%s5146_s5 + $0x3c0] sm:$0xff] }
  0xb4   : > { %2923 = vmatprep.subr.mxu0 %v1511_v20  ;;  %2958 = vmatprep.subr.mxu1 %v1543_v22  ;;  %v1563_v18 = vld [vmem:[%s5146_s5 + $0x240] sm:$0xff]  ;;  %v1578_v20 = vld [vmem:[%s5146_s5 + $0x2b8] sm:$0xff] }
  0xb5   : > { %2924 = vmatpush3.msra.mxu0 %v1495_v2  ;;  %2959 = vmatpush3.msra.mxu1 %v1527_v23  ;;  %v1595_v19 = vld [vmem:[%s5146_s5 + $0x340] sm:$0xff]  ;;  %v1610_v22 = vld [vmem:[%s5146_s5 + $0x3b8] sm:$0xff] }
  0xb6   : > { %2925 = vmatprep.subr.mxu0 %v1510_v8  ;;  %2960 = vmatprep.subr.mxu1 %v1542_v45  ;;  %v1562_v2 = vld [vmem:[%s5146_s5 + $0x238] sm:$0xff]  ;;  %v1577_v8 = vld [vmem:[%s5146_s5 + $0x2b0] sm:$0xff] }
  0xb7   : > { %2926 = vmatpush3.msra.mxu0 %v1494_v12  ;;  %2961 = vmatpush3.msra.mxu1 %v1526_v24  ;;  %v1594_v23 = vld [vmem:[%s5146_s5 + $0x338] sm:$0xff]  ;;  %v1609_v45 = vld [vmem:[%s5146_s5 + $0x3b0] sm:$0xff] }
  0xb8   : > { %2927 = vmatprep.subr.mxu0 %v1509_v26  ;;  %2962 = vmatprep.subr.mxu1 %v1541_v27  ;;  %v1561_v12 = vld [vmem:[%s5146_s5 + $0x230] sm:$0xff]  ;;  %v1576_v26 = vld [vmem:[%s5146_s5 + $0x2a8] sm:$0xff] }
  0xb9   : > { %2928 = vmatpush3.msra.mxu0 %v1493_v28  ;;  %2963 = vmatpush3.msra.mxu1 %v1525_v30  ;;  %v1593_v24 = vld [vmem:[%s5146_s5 + $0x330] sm:$0xff]  ;;  %v1608_v27 = vld [vmem:[%s5146_s5 + $0x3a8] sm:$0xff] }
  0xba   : > { %2929 = vmatprep.subr.mxu0 %v1508_v59  ;;  %2964 = vmatprep.subr.mxu1 %v1540_v31  ;;  %v1560_v28 = vld [vmem:[%s5146_s5 + $0x228] sm:$0xff]  ;;  %v1575_v59 = vld [vmem:[%s5146_s5 + $0x2a0] sm:$0xff] }
  0xbb   : > { %2930 = vmatpush3.msra.mxu0 %v1492_v32  ;;  %2965 = vmatpush3.msra.mxu1 %v1524_v33  ;;  %v1592_v30 = vld [vmem:[%s5146_s5 + $0x328] sm:$0xff]  ;;  %v1607_v31 = vld [vmem:[%s5146_s5 + $0x3a0] sm:$0xff] }
  0xbc   : > { %2931 = vmatprep.subr.mxu0 %v1507_v46  ;;  %2966 = vmatprep.subr.mxu1 %v1539_v34  ;;  %v1559_v32 = vld [vmem:[%s5146_s5 + $0x220] sm:$0xff]  ;;  %v1574_v46 = vld [vmem:[%s5146_s5 + $0x298] sm:$0xff] }
  0xbd   : > { %2932 = vmatpush3.msra.mxu0 %v1491_v35  ;;  %1811 = vmatprep.mubr.f32.mxu0 %v3587_v47  ;;  %v1585_v47 = vld [vmem:[%s5146_s5 + $0x2f0] sm:$0xff]  ;;  %v1591_v33 = vld [vmem:[%s5146_s5 + $0x320] sm:$0xff]  ;;  %v1606_v34 = vld [vmem:[%s5146_s5 + $0x398] sm:$0xff] }
  0xbe   : > { %2967 = vmatpush3.msra.mxu1 %v1523_v36  ;;  %1881 = vmatprep.mubr.f32.mxu1 %v3597_v49  ;;  %v1617_v49 = vld [vmem:[%s5146_s5 + $0x3f0] sm:$0xff]  ;;  %v1558_v35 = vld [vmem:[%s5146_s5 + $0x218] sm:$0xff] }
  0xbf   : > { %1812 = vmatmul.mubr.f32.vlgmr.msra.gmra.mxu0 %v3592_v48  ;;  %1882 = vmatmul.mubr.f32.vlgmr.msra.gmra.mxu1 %v3602_v50  ;;  %v1601_v48 = vld [vmem:[%s5146_s5 + $0x370] sm:$0xff]  ;;  %v1584_v50 = vld [vmem:[%s5146_s5 + $0x2e8] sm:$0xff]  ;;  %v1590_v36 = vld [vmem:[%s5146_s5 + $0x318] sm:$0xff] }
  0xc0   : > { %2971 = vmatprep.subr.mxu0 %v1586_v37  ;;  %3006 = vmatprep.subr.mxu1 %v1618_v38  ;;  %v1573_v37 = vld [vmem:[%s5146_s5 + $0x290] sm:$0xff] }
  0xc1   : > { %2972 = vmatpush3.msra.mxu0 %v1570_v39  ;;  %3007 = vmatpush3.msra.mxu1 %v1602_v41  ;;  %v1605_v38 = vld [vmem:[%s5146_s5 + $0x390] sm:$0xff] }
  0xc2   : > { %2973 = vmatprep.subr.mxu0 %v1585_v47  ;;  %3008 = vmatprep.subr.mxu1 %v1617_v49  ;;  %v1557_v39 = vld [vmem:[%s5146_s5 + $0x210] sm:$0xff]  ;;  %v1572_v47 = vld [vmem:[%s5146_s5 + $0x288] sm:$0xff] }
  0xc3   : > { %2974 = vmatpush3.msra.mxu0 %v1569_v51  ;;  %3009 = vmatpush3.msra.mxu1 %v1601_v48  ;;  %v1589_v41 = vld [vmem:[%s5146_s5 + $0x310] sm:$0xff]  ;;  %v1604_v49 = vld [vmem:[%s5146_s5 + $0x388] sm:$0xff] }
  0xc4   : > { %2975 = vmatprep.subr.mxu0 %v1584_v50  ;;  %3010 = vmatprep.subr.mxu1 %v1616_v52  ;;  %v1556_v51 = vld [vmem:[%s5146_s5 + $0x208] sm:$0xff]  ;;  %v1571_v50 = vld [vmem:[%s5146_s5 + $0x280] sm:$0xff] }
  0xc5   : > { %2976 = vmatpush3.msra.mxu0 %v1568_v53  ;;  %3011 = vmatpush3.msra.mxu1 %v1600_v54  ;;  %v1588_v48 = vld [vmem:[%s5146_s5 + $0x308] sm:$0xff]  ;;  %v1603_v52 = vld [vmem:[%s5146_s5 + $0x380] sm:$0xff] }
  0xc6   : > { %2977 = vmatprep.subr.mxu0 %v1583_v55  ;;  %3012 = vmatprep.subr.mxu1 %v1615_v56  ;;  %v1555_v53 = vld [vmem:[%s5146_s5 + $0x200] sm:$0xff]  ;;  %v1650_v55 = vld [vmem:[%s5146_s5 + $0x4f8] sm:$0xff] }
  0xc7   : > { %2978 = vmatpush3.msra.mxu0 %v1567_v57  ;;  %3013 = vmatpush3.msra.mxu1 %v1599_v58  ;;  %v1587_v54 = vld [vmem:[%s5146_s5 + $0x300] sm:$0xff]  ;;  %v1682_v56 = vld [vmem:[%s5146_s5 + $0x5f8] sm:$0xff] }
  0xc8   : > { %2979 = vmatprep.subr.mxu0 %v1582_v60  ;;  %3014 = vmatprep.subr.mxu1 %v1614_v61  ;;  %v1634_v57 = vld [vmem:[%s5146_s5 + $0x478] sm:$0xff]  ;;  %v1681_v60 = vld [vmem:[%s5146_s5 + $0x5f0] sm:$0xff]  ;;  %v1648_v61 = vld [vmem:[%s5146_s5 + $0x4e8] sm:$0xff] }
  0xc9   : > { %2980 = vmatpush3.msra.mxu0 %v1566_v63  ;;  %3015 = vmatpush3.msra.mxu1 %v1598_v0  ;;  %v1666_v58 = vld [vmem:[%s5146_s5 + $0x578] sm:$0xff]  ;;  %v1680_v63 = vld [vmem:[%s5146_s5 + $0x5e8] sm:$0xff] }
  0xca   : > { %2981 = vmatprep.subr.mxu0 %v1581_v1  ;;  %3016 = vmatprep.subr.mxu1 %v1613_v3  ;;  %v1664_v0 = vld [vmem:[%s5146_s5 + $0x568] sm:$0xff]  ;;  %v1647_v1 = vld [vmem:[%s5146_s5 + $0x4e0] sm:$0xff] }
  0xcb   : > { %2982 = vmatpush3.msra.mxu0 %v1565_v4  ;;  %3017 = vmatpush3.msra.mxu1 %v1597_v5  ;;  %v1679_v3 = vld [vmem:[%s5146_s5 + $0x5e0] sm:$0xff] }
  0xcc   : > { %2983 = vmatprep.subr.mxu0 %v1580_v6  ;;  %3018 = vmatprep.subr.mxu1 %v1612_v7  ;;  %v1631_v4 = vld [vmem:[%s5146_s5 + $0x460] sm:$0xff]  ;;  %v1646_v6 = vld [vmem:[%s5146_s5 + $0x4d8] sm:$0xff] }
  0xcd   : > { %2984 = vmatpush3.msra.mxu0 %v1564_v9  ;;  %3019 = vmatpush3.msra.mxu1 %v1596_v10  ;;  %v1663_v5 = vld [vmem:[%s5146_s5 + $0x560] sm:$0xff]  ;;  %v1678_v7 = vld [vmem:[%s5146_s5 + $0x5d8] sm:$0xff] }
  0xce   : > { %2985 = vmatprep.subr.mxu0 %v1579_v11  ;;  %3020 = vmatprep.subr.mxu1 %v1611_v13  ;;  %v1630_v9 = vld [vmem:[%s5146_s5 + $0x458] sm:$0xff]  ;;  %v1645_v11 = vld [vmem:[%s5146_s5 + $0x4d0] sm:$0xff] }
  0xcf   : > { %2986 = vmatpush3.msra.mxu0 %v1563_v18  ;;  %3021 = vmatpush3.msra.mxu1 %v1595_v19  ;;  %v1662_v10 = vld [vmem:[%s5146_s5 + $0x558] sm:$0xff]  ;;  %v1677_v13 = vld [vmem:[%s5146_s5 + $0x5d0] sm:$0xff] }
  0xd0   : > { %2987 = vmatprep.subr.mxu0 %v1578_v20  ;;  %3022 = vmatprep.subr.mxu1 %v1610_v22  ;;  %v1629_v18 = vld [vmem:[%s5146_s5 + $0x450] sm:$0xff]  ;;  %v1644_v20 = vld [vmem:[%s5146_s5 + $0x4c8] sm:$0xff] }
  0xd1   : > { %2988 = vmatpush3.msra.mxu0 %v1562_v2  ;;  %3023 = vmatpush3.msra.mxu1 %v1594_v23  ;;  %v1661_v19 = vld [vmem:[%s5146_s5 + $0x550] sm:$0xff]  ;;  %v1676_v22 = vld [vmem:[%s5146_s5 + $0x5c8] sm:$0xff] }
  0xd2   : > { %2989 = vmatprep.subr.mxu0 %v1577_v8  ;;  %3024 = vmatprep.subr.mxu1 %v1609_v45  ;;  %v1628_v2 = vld [vmem:[%s5146_s5 + $0x448] sm:$0xff]  ;;  %v1643_v8 = vld [vmem:[%s5146_s5 + $0x4c0] sm:$0xff] }
  0xd3   : > { %2990 = vmatpush3.msra.mxu0 %v1561_v12  ;;  %3025 = vmatpush3.msra.mxu1 %v1593_v24  ;;  %v1660_v23 = vld [vmem:[%s5146_s5 + $0x548] sm:$0xff]  ;;  %v1675_v45 = vld [vmem:[%s5146_s5 + $0x5c0] sm:$0xff] }
  0xd4   : > { %2991 = vmatprep.subr.mxu0 %v1576_v26  ;;  %3026 = vmatprep.subr.mxu1 %v1608_v27  ;;  %v1627_v12 = vld [vmem:[%s5146_s5 + $0x440] sm:$0xff]  ;;  %v1642_v26 = vld [vmem:[%s5146_s5 + $0x4b8] sm:$0xff] }
  0xd5   : > { %2992 = vmatpush3.msra.mxu0 %v1560_v28  ;;  %3027 = vmatpush3.msra.mxu1 %v1592_v30  ;;  %v1659_v24 = vld [vmem:[%s5146_s5 + $0x540] sm:$0xff]  ;;  %v1674_v27 = vld [vmem:[%s5146_s5 + $0x5b8] sm:$0xff] }
  0xd6   : > { %2993 = vmatprep.subr.mxu0 %v1575_v59  ;;  %3028 = vmatprep.subr.mxu1 %v1607_v31  ;;  %v1626_v28 = vld [vmem:[%s5146_s5 + $0x438] sm:$0xff]  ;;  %v1641_v59 = vld [vmem:[%s5146_s5 + $0x4b0] sm:$0xff] }
  0xd7   : > { %2994 = vmatpush3.msra.mxu0 %v1559_v32  ;;  %3029 = vmatpush3.msra.mxu1 %v1591_v33  ;;  %v1658_v30 = vld [vmem:[%s5146_s5 + $0x538] sm:$0xff]  ;;  %v1673_v31 = vld [vmem:[%s5146_s5 + $0x5b0] sm:$0xff] }
  0xd8   : > { %2995 = vmatprep.subr.mxu0 %v1574_v46  ;;  %3030 = vmatprep.subr.mxu1 %v1606_v34  ;;  %v1625_v32 = vld [vmem:[%s5146_s5 + $0x430] sm:$0xff]  ;;  %v1640_v46 = vld [vmem:[%s5146_s5 + $0x4a8] sm:$0xff] }
  0xd9   : > { %2996 = vmatpush3.msra.mxu0 %v1558_v35  ;;  %3031 = vmatpush3.msra.mxu1 %v1590_v36  ;;  %v1657_v33 = vld [vmem:[%s5146_s5 + $0x530] sm:$0xff]  ;;  %v1672_v34 = vld [vmem:[%s5146_s5 + $0x5a8] sm:$0xff] }
  0xda   : > { %2997 = vmatprep.subr.mxu0 %v1573_v37  ;;  %3032 = vmatprep.subr.mxu1 %v1605_v38  ;;  %v1624_v35 = vld [vmem:[%s5146_s5 + $0x428] sm:$0xff]  ;;  %v1639_v37 = vld [vmem:[%s5146_s5 + $0x4a0] sm:$0xff] }
  0xdb   : > { %2998 = vmatpush3.msra.mxu0 %v1557_v39  ;;  %3033 = vmatpush3.msra.mxu1 %v1589_v41  ;;  %v1656_v36 = vld [vmem:[%s5146_s5 + $0x528] sm:$0xff]  ;;  %v1671_v38 = vld [vmem:[%s5146_s5 + $0x5a0] sm:$0xff] }
  0xdc   : > { %2999 = vmatprep.subr.mxu0 %v1572_v47  ;;  %3034 = vmatprep.subr.mxu1 %v1604_v49  ;;  %v1623_v39 = vld [vmem:[%s5146_s5 + $0x420] sm:$0xff]  ;;  %v1638_v47 = vld [vmem:[%s5146_s5 + $0x498] sm:$0xff] }
  0xdd   : > { %3000 = vmatpush3.msra.mxu0 %v1556_v51  ;;  %3035 = vmatpush3.msra.mxu1 %v1588_v48  ;;  %v1655_v41 = vld [vmem:[%s5146_s5 + $0x520] sm:$0xff]  ;;  %v1670_v49 = vld [vmem:[%s5146_s5 + $0x598] sm:$0xff] }
  0xde   : > { %3001 = vmatprep.subr.mxu0 %v1571_v50  ;;  %3036 = vmatprep.subr.mxu1 %v1603_v52  ;;  %v1622_v51 = vld [vmem:[%s5146_s5 + $0x418] sm:$0xff]  ;;  %v1637_v50 = vld [vmem:[%s5146_s5 + $0x490] sm:$0xff] }
  0xdf   : > { %3002 = vmatpush3.msra.mxu0 %v1555_v53  ;;  %1951 = vmatprep.mubr.f32.mxu0 %v3815_v17  ;;  %v1649_v17 = vld [vmem:[%s5146_s5 + $0x4f0] sm:$0xff]  ;;  %v1654_v48 = vld [vmem:[%s5146_s5 + $0x518] sm:$0xff] }
  0xe0   : > { %3037 = vmatpush3.msra.mxu1 %v1587_v54  ;;  %1952 = vmatmul.mubr.f32.vlgmr.msra.gmra.mxu0 %v3823_v21  ;;  %v1633_v21 = vld [vmem:[%s5146_s5 + $0x470] sm:$0xff] }
  0xe1   : > { %2021 = vmatprep.mubr.f32.mxu1 %v3833_v25  ;;  %3041 = vmatprep.subr.mxu0 %v1650_v55  ;;  %v1665_v25 = vld [vmem:[%s5146_s5 + $0x570] sm:$0xff]  ;;  %v1636_v55 = vld [vmem:[%s5146_s5 + $0x488] sm:$0xff] }
  0xe2   : > { %3076 = vmatprep.subr.mxu1 %v1682_v56  ;;  %2022 = vmatmul.mubr.f32.vlgmr.msra.gmra.mxu1 %v3843_v29  ;;  %v1632_v29 = vld [vmem:[%s5146_s5 + $0x468] sm:$0xff]  ;;  %v1669_v52 = vld [vmem:[%s5146_s5 + $0x590] sm:$0xff] }
  0xe3   : > { %3042 = vmatpush3.msra.mxu0 %v1634_v57  ;;  %3077 = vmatpush3.msra.mxu1 %v1666_v58  ;;  %v1621_v53 = vld [vmem:[%s5146_s5 + $0x410] sm:$0xff]  ;;  %v1668_v56 = vld [vmem:[%s5146_s5 + $0x588] sm:$0xff] }
  0xe4   : > { %3043 = vmatprep.subr.mxu0 %v1649_v17  ;;  %3078 = vmatprep.subr.mxu1 %v1681_v60  ;;  %v1653_v54 = vld [vmem:[%s5146_s5 + $0x510] sm:$0xff]  ;;  %v1620_v57 = vld [vmem:[%s5146_s5 + $0x408] sm:$0xff]  ;;  %v1635_v17 = vld [vmem:[%s5146_s5 + $0x480] sm:$0xff] }
  0xe5   : > { %3044 = vmatpush3.msra.mxu0 %v1633_v21  ;;  %3079 = vmatpush3.msra.mxu1 %v1665_v25  ;;  %v1652_v58 = vld [vmem:[%s5146_s5 + $0x508] sm:$0xff]  ;;  %v1667_v60 = vld [vmem:[%s5146_s5 + $0x580] sm:$0xff] }
  0xe6   : > { %3045 = vmatprep.subr.mxu0 %v1648_v61  ;;  %3080 = vmatprep.subr.mxu1 %v1680_v63  ;;  %v1619_v21 = vld [vmem:[%s5146_s5 + $0x400] sm:$0xff]  ;;  %v1714_v61 = vld [vmem:[%s5146_s5 + $0x6f8] sm:$0xff] }
  0xe7   : > { %3046 = vmatpush3.msra.mxu0 %v1632_v29  ;;  %3081 = vmatpush3.msra.mxu1 %v1664_v0  ;;  %v1651_v25 = vld [vmem:[%s5146_s5 + $0x500] sm:$0xff]  ;;  %v1746_v63 = vld [vmem:[%s5146_s5 + $0x7f8] sm:$0xff] }
  0xe8   : > { %3047 = vmatprep.subr.mxu0 %v1647_v1  ;;  %3082 = vmatprep.subr.mxu1 %v1679_v3  ;;  %v1698_v29 = vld [vmem:[%s5146_s5 + $0x678] sm:$0xff]  ;;  %v1745_v1 = vld [vmem:[%s5146_s5 + $0x7f0] sm:$0xff]  ;;  %v1712_v3 = vld [vmem:[%s5146_s5 + $0x6e8] sm:$0xff] }
  0xe9   : > { %3048 = vmatpush3.msra.mxu0 %v1631_v4  ;;  %3083 = vmatpush3.msra.mxu1 %v1663_v5  ;;  %v1730_v0 = vld [vmem:[%s5146_s5 + $0x778] sm:$0xff]  ;;  %v1744_v4 = vld [vmem:[%s5146_s5 + $0x7e8] sm:$0xff] }
  0xea   : > { %3049 = vmatprep.subr.mxu0 %v1646_v6  ;;  %3084 = vmatprep.subr.mxu1 %v1678_v7  ;;  %v1728_v5 = vld [vmem:[%s5146_s5 + $0x768] sm:$0xff]  ;;  %v1711_v6 = vld [vmem:[%s5146_s5 + $0x6e0] sm:$0xff] }
  0xeb   : > { %3050 = vmatpush3.msra.mxu0 %v1630_v9  ;;  %3085 = vmatpush3.msra.mxu1 %v1662_v10  ;;  %v1743_v7 = vld [vmem:[%s5146_s5 + $0x7e0] sm:$0xff] }
  0xec   : > { %3051 = vmatprep.subr.mxu0 %v1645_v11  ;;  %3086 = vmatprep.subr.mxu1 %v1677_v13  ;;  %v1695_v9 = vld [vmem:[%s5146_s5 + $0x660] sm:$0xff]  ;;  %v1710_v11 = vld [vmem:[%s5146_s5 + $0x6d8] sm:$0xff] }
  0xed   : > { %3052 = vmatpush3.msra.mxu0 %v1629_v18  ;;  %3087 = vmatpush3.msra.mxu1 %v1661_v19  ;;  %v1727_v10 = vld [vmem:[%s5146_s5 + $0x760] sm:$0xff]  ;;  %v1742_v13 = vld [vmem:[%s5146_s5 + $0x7d8] sm:$0xff] }
  0xee   : > { %3053 = vmatprep.subr.mxu0 %v1644_v20  ;;  %3088 = vmatprep.subr.mxu1 %v1676_v22  ;;  %v1694_v18 = vld [vmem:[%s5146_s5 + $0x658] sm:$0xff]  ;;  %v1709_v20 = vld [vmem:[%s5146_s5 + $0x6d0] sm:$0xff] }
  0xef   : > { %3054 = vmatpush3.msra.mxu0 %v1628_v2  ;;  %3089 = vmatpush3.msra.mxu1 %v1660_v23  ;;  %v1726_v19 = vld [vmem:[%s5146_s5 + $0x758] sm:$0xff]  ;;  %v1741_v22 = vld [vmem:[%s5146_s5 + $0x7d0] sm:$0xff] }
  0xf0   : > { %3055 = vmatprep.subr.mxu0 %v1643_v8  ;;  %3090 = vmatprep.subr.mxu1 %v1675_v45  ;;  %v1693_v2 = vld [vmem:[%s5146_s5 + $0x650] sm:$0xff]  ;;  %v1708_v8 = vld [vmem:[%s5146_s5 + $0x6c8] sm:$0xff] }
  0xf1   : > { %3056 = vmatpush3.msra.mxu0 %v1627_v12  ;;  %3091 = vmatpush3.msra.mxu1 %v1659_v24  ;;  %v1725_v23 = vld [vmem:[%s5146_s5 + $0x750] sm:$0xff]  ;;  %v1740_v45 = vld [vmem:[%s5146_s5 + $0x7c8] sm:$0xff] }
  0xf2   : > { %3057 = vmatprep.subr.mxu0 %v1642_v26  ;;  %3092 = vmatprep.subr.mxu1 %v1674_v27  ;;  %v1692_v12 = vld [vmem:[%s5146_s5 + $0x648] sm:$0xff]  ;;  %v1707_v26 = vld [vmem:[%s5146_s5 + $0x6c0] sm:$0xff] }
  0xf3   : > { %3058 = vmatpush3.msra.mxu0 %v1626_v28  ;;  %3093 = vmatpush3.msra.mxu1 %v1658_v30  ;;  %v1724_v24 = vld [vmem:[%s5146_s5 + $0x748] sm:$0xff]  ;;  %v1739_v27 = vld [vmem:[%s5146_s5 + $0x7c0] sm:$0xff] }
  0xf4   : > { %3059 = vmatprep.subr.mxu0 %v1641_v59  ;;  %3094 = vmatprep.subr.mxu1 %v1673_v31  ;;  %v1691_v28 = vld [vmem:[%s5146_s5 + $0x640] sm:$0xff]  ;;  %v1706_v59 = vld [vmem:[%s5146_s5 + $0x6b8] sm:$0xff] }
  0xf5   : > { %3060 = vmatpush3.msra.mxu0 %v1625_v32  ;;  %3095 = vmatpush3.msra.mxu1 %v1657_v33  ;;  %v1723_v30 = vld [vmem:[%s5146_s5 + $0x740] sm:$0xff]  ;;  %v1738_v31 = vld [vmem:[%s5146_s5 + $0x7b8] sm:$0xff] }
  0xf6   : > { %3061 = vmatprep.subr.mxu0 %v1640_v46  ;;  %3096 = vmatprep.subr.mxu1 %v1672_v34  ;;  %v1690_v32 = vld [vmem:[%s5146_s5 + $0x638] sm:$0xff]  ;;  %v1705_v46 = vld [vmem:[%s5146_s5 + $0x6b0] sm:$0xff] }
  0xf7   : > { %3062 = vmatpush3.msra.mxu0 %v1624_v35  ;;  %3097 = vmatpush3.msra.mxu1 %v1656_v36  ;;  %v1722_v33 = vld [vmem:[%s5146_s5 + $0x738] sm:$0xff]  ;;  %v1737_v34 = vld [vmem:[%s5146_s5 + $0x7b0] sm:$0xff] }
  0xf8   : > { %3063 = vmatprep.subr.mxu0 %v1639_v37  ;;  %3098 = vmatprep.subr.mxu1 %v1671_v38  ;;  %v1689_v35 = vld [vmem:[%s5146_s5 + $0x630] sm:$0xff]  ;;  %v1704_v37 = vld [vmem:[%s5146_s5 + $0x6a8] sm:$0xff] }
  0xf9   : > { %3064 = vmatpush3.msra.mxu0 %v1623_v39  ;;  %3099 = vmatpush3.msra.mxu1 %v1655_v41  ;;  %v1721_v36 = vld [vmem:[%s5146_s5 + $0x730] sm:$0xff]  ;;  %v1736_v38 = vld [vmem:[%s5146_s5 + $0x7a8] sm:$0xff] }
  0xfa   : > { %3065 = vmatprep.subr.mxu0 %v1638_v47  ;;  %3100 = vmatprep.subr.mxu1 %v1670_v49  ;;  %v1688_v39 = vld [vmem:[%s5146_s5 + $0x628] sm:$0xff]  ;;  %v1703_v47 = vld [vmem:[%s5146_s5 + $0x6a0] sm:$0xff] }
  0xfb   : > { %3066 = vmatpush3.msra.mxu0 %v1622_v51  ;;  %3101 = vmatpush3.msra.mxu1 %v1654_v48  ;;  %v1720_v41 = vld [vmem:[%s5146_s5 + $0x728] sm:$0xff]  ;;  %v1735_v49 = vld [vmem:[%s5146_s5 + $0x7a0] sm:$0xff] }
  0xfc   : > { %3067 = vmatprep.subr.mxu0 %v1637_v50  ;;  %3102 = vmatprep.subr.mxu1 %v1669_v52  ;;  %v1687_v51 = vld [vmem:[%s5146_s5 + $0x620] sm:$0xff]  ;;  %v1702_v50 = vld [vmem:[%s5146_s5 + $0x698] sm:$0xff] }
  0xfd   : > { %3068 = vmatpush3.msra.mxu0 %v1621_v53  ;;  %3103 = vmatpush3.msra.mxu1 %v1653_v54  ;;  %v1719_v48 = vld [vmem:[%s5146_s5 + $0x720] sm:$0xff]  ;;  %v1734_v52 = vld [vmem:[%s5146_s5 + $0x798] sm:$0xff] }
  0xfe   : > { %3069 = vmatprep.subr.mxu0 %v1636_v55  ;;  %3104 = vmatprep.subr.mxu1 %v1668_v56  ;;  %v1686_v53 = vld [vmem:[%s5146_s5 + $0x618] sm:$0xff]  ;;  %v1701_v55 = vld [vmem:[%s5146_s5 + $0x690] sm:$0xff] }
  0xff   : > { %3070 = vmatpush3.msra.mxu0 %v1620_v57  ;;  %3105 = vmatpush3.msra.mxu1 %v1652_v58  ;;  %v1718_v54 = vld [vmem:[%s5146_s5 + $0x718] sm:$0xff]  ;;  %v1733_v56 = vld [vmem:[%s5146_s5 + $0x790] sm:$0xff] }
 0x100   : > { %3071 = vmatprep.subr.mxu0 %v1635_v17  ;;  %3106 = vmatprep.subr.mxu1 %v1667_v60  ;;  %v1685_v57 = vld [vmem:[%s5146_s5 + $0x610] sm:$0xff]  ;;  %v1700_v17 = vld [vmem:[%s5146_s5 + $0x688] sm:$0xff] }
 0x101   : > { %3072 = vmatpush3.msra.mxu0 %v1619_v21  ;;  %2091 = vmatprep.mubr.f32.mxu0 %v3929_v14  ;;  %v1713_v14 = vld [vmem:[%s5146_s5 + $0x6f0] sm:$0xff]  ;;  %v1732_v60 = vld [vmem:[%s5146_s5 + $0x788] sm:$0xff] }
 0x102   : > { %3107 = vmatpush3.msra.mxu1 %v1651_v25  ;;  %2092 = vmatmul.mubr.f32.vlgmr.msra.gmra.mxu0 %v3933_v15  ;;  %v1697_v15 = vld [vmem:[%s5146_s5 + $0x670] sm:$0xff]  ;;  %v1684_v21 = vld [vmem:[%s5146_s5 + $0x608] sm:$0xff] }
 0x103   : > { %2161 = vmatprep.mubr.f32.mxu1 %v3937_v16  ;;  %3111 = vmatprep.subr.mxu0 %v1714_v61  ;;  %v1729_v16 = vld [vmem:[%s5146_s5 + $0x770] sm:$0xff]  ;;  %v1716_v25 = vld [vmem:[%s5146_s5 + $0x708] sm:$0xff]  ;;  %v1699_v61 = vld [vmem:[%s5146_s5 + $0x680] sm:$0xff] }
 0x104   : > { %3146 = vmatprep.subr.mxu1 %v1746_v63  ;;  %2162 = vmatmul.mubr.f32.vlgmr.msra.gmra.mxu1 %v3947_v40  ;;  %v1696_v40 = vld [vmem:[%s5146_s5 + $0x668] sm:$0xff]  ;;  %v1717_v58 = vld [vmem:[%s5146_s5 + $0x710] sm:$0xff]  ;;  %v1731_v63 = vld [vmem:[%s5146_s5 + $0x780] sm:$0xff] }
 0x105   : > { %3112 = vmatpush3.msra.mxu0 %v1698_v29  ;;  %3147 = vmatpush3.msra.mxu1 %v1730_v0  ;;  %v1683_v29 = vld [vmem:[%s5146_s5 + $0x600] sm:$0xff] }
 0x106   : > { %3113 = vmatprep.subr.mxu0 %v1713_v14  ;;  %3148 = vmatprep.subr.mxu1 %v1745_v1  ;;  %v1715_v0 = vld [vmem:[%s5146_s5 + $0x700] sm:$0xff]  ;;  %v2653_v14 = vpop.f32.mrf.mxu0  ;;  %v2688_v1 = vpop.f32.mrf.mxu1 }
 0x107   : > { %3114 = vmatpush3.msra.mxu0 %v1697_v15  ;;  %3149 = vmatpush3.msra.mxu1 %v1729_v16 }
 0x108   : > { %3115 = vmatprep.subr.mxu0 %v1712_v3  ;;  %3150 = vmatprep.subr.mxu1 %v1744_v4  ;;  %v2654_v15 = vpop.f32.mrf.mxu0  ;;  %v848_v4 = vld [vmem:[%s5145_s4] sm:$0x1] }
 0x109   : > { %3116 = vmatpush3.msra.mxu0 %v1696_v40  ;;  %3151 = vmatpush3.msra.mxu1 %v1728_v5  ;;  %v2655_v3 = vadd.f32 %v2654_v15, %v2653_v14  ;;  %v2689_v40 = vpop.f32.mrf.mxu1 }
 0x10a   : > { %3117 = vmatprep.subr.mxu0 %v1711_v6  ;;  %3152 = vmatprep.subr.mxu1 %v1743_v7  ;;  %v2690_v7 = vadd.f32 %v2689_v40, %v2688_v1 }
 0x10b   : > { %3118 = vmatpush3.msra.mxu0 %v1695_v9  ;;  %3153 = vmatpush3.msra.mxu1 %v1727_v10 }
 0x10c   : > { %3119 = vmatprep.subr.mxu0 %v1710_v11  ;;  %3154 = vmatprep.subr.mxu1 %v1742_v13 }
 0x10d   : > { %3120 = vmatpush3.msra.mxu0 %v1694_v18  ;;  %3155 = vmatpush3.msra.mxu1 %v1726_v19 }
 0x10e   : > { %3121 = vmatprep.subr.mxu0 %v1709_v20  ;;  %3156 = vmatprep.subr.mxu1 %v1741_v22 }
 0x10f   : > { %3122 = vmatpush3.msra.mxu0 %v1693_v2  ;;  %3157 = vmatpush3.msra.mxu1 %v1725_v23 }
 0x110   : > { %3123 = vmatprep.subr.mxu0 %v1708_v8  ;;  %3158 = vmatprep.subr.mxu1 %v1740_v45 }
 0x111   : > { %3124 = vmatpush3.msra.mxu0 %v1692_v12  ;;  %3159 = vmatpush3.msra.mxu1 %v1724_v24 }
 0x112   : > { %3125 = vmatprep.subr.mxu0 %v1707_v26  ;;  %3160 = vmatprep.subr.mxu1 %v1739_v27 }
 0x113   : > { %3126 = vmatpush3.msra.mxu0 %v1691_v28  ;;  %3161 = vmatpush3.msra.mxu1 %v1723_v30 }
 0x114   : > { %3127 = vmatprep.subr.mxu0 %v1706_v59  ;;  %3162 = vmatprep.subr.mxu1 %v1738_v31  ;;  %v3253_v31 = vmov 0.0  }
 0x115   : > { %3128 = vmatpush3.msra.mxu0 %v1690_v32  ;;  %3163 = vmatpush3.msra.mxu1 %v1722_v33  ;;  %v2310_v32 = vld [vmem:[%s5147_s6 + $0x18] sm:$0xff]  ;;  %2540 = vst [vmem:[%s5096_s30] sm:$0x1] %v3253_v31 }
 0x116   : > { %3129 = vmatprep.subr.mxu0 %v1705_v46  ;;  %3164 = vmatprep.subr.mxu1 %v1737_v34  ;;  %v2389_v33 = vld [vmem:[%s5149_s8 + $0x18] sm:$0xff]  ;;  %v2309_v46 = vld [vmem:[%s5147_s6 + $0x10] sm:$0xff] }
 0x117   : > { %3130 = vmatpush3.msra.mxu0 %v1689_v35  ;;  %3165 = vmatpush3.msra.mxu1 %v1721_v36  ;;  %v2388_v34 = vld [vmem:[%s5149_s8 + $0x10] sm:$0xff]  ;;  %v2308_v35 = vld [vmem:[%s5147_s6 + $0x8] sm:$0xff] }
 0x118   : > { %3131 = vmatprep.subr.mxu0 %v1704_v37  ;;  %3166 = vmatprep.subr.mxu1 %v1736_v38  ;;  %v2723_v16 = vpop.f32.mrf.mxu0  ;;  %v2387_v36 = vld [vmem:[%s5149_s8 + $0x8] sm:$0xff]  ;;  %v2307_v37 = vld [vmem:[%s5147_s6] sm:$0xff] }
 0x119   : > { %3132 = vmatpush3.msra.mxu0 %v1688_v39  ;;  %3167 = vmatpush3.msra.mxu1 %v1720_v41  ;;  %v2386_v38 = vld [vmem:[%s5149_s8] sm:$0xff] }
 0x11a   : > { %3133 = vmatprep.subr.mxu0 %v1703_v47  ;;  %3168 = vmatprep.subr.mxu1 %v1735_v49  ;;  %v2758_v5 = vpop.f32.mrf.mxu1  ;;  %v2724_v6 = vpop.f32.mrf.mxu0 }
 0x11b   : > { %3134 = vmatpush3.msra.mxu0 %v1687_v51  ;;  %3169 = vmatpush3.msra.mxu1 %v1719_v48 }
 0x11c   : > { %3135 = vmatprep.subr.mxu0 %v1702_v50  ;;  %3170 = vmatprep.subr.mxu1 %v1734_v52  ;;  %v2759_v10 = vpop.f32.mrf.mxu1 }
 0x11d   : > { %3136 = vmatpush3.msra.mxu0 %v1686_v53  ;;  %3171 = vmatpush3.msra.mxu1 %v1718_v54  ;;  %v2760_v18 = vadd.f32 %v2759_v10, %v2758_v5  ;;  %v2462_v10 = vld [vmem:[%s5151_s10] sm:$0xff] }
 0x11e   : > { %3137 = vmatprep.subr.mxu0 %v1701_v55  ;;  %3172 = vmatprep.subr.mxu1 %v1733_v56 }
 0x11f   : > { %3138 = vmatpush3.msra.mxu0 %v1685_v57  ;;  %3173 = vmatpush3.msra.mxu1 %v1717_v58 }
 0x120   : > { %3139 = vmatprep.subr.mxu0 %v1700_v17  ;;  %3174 = vmatprep.subr.mxu1 %v1732_v60 }
 0x121   : > { %3140 = vmatpush3.msra.mxu0 %v1684_v21  ;;  %3175 = vmatpush3.msra.mxu1 %v1716_v25 }
 0x122   : > { %3141 = vmatprep.subr.mxu0 %v1699_v61  ;;  %3176 = vmatprep.subr.mxu1 %v1731_v63 }
 0x123   : > { %3142 = vmatpush3.msra.mxu0 %v1683_v29  ;;  %2231 = vmatprep.mubr.f32.mxu0 %v3951_v42  ;;  %v998_v42 = vadd.f32 %v2655_v3, %v848_v4 }
 0x124   : > { %3177 = vmatpush3.msra.mxu1 %v1715_v0  ;;  %2301 = vmatprep.mubr.f32.mxu1 %v3965_v44  ;;  %v2725_v44 = vadd.f32 %v2724_v6, %v2723_v16 }
 0x125   : > { %2232 = vmatmul.mubr.f32.vlgmr.msra.gmra.mxu0 %v3955_v43  ;;  %2302 = vmatmul.mubr.f32.vlgmr.msra.gmra.mxu1 %v3969_v62  ;;  %v1068_v43 = vadd.f32 %v2690_v7, %v998_v42  ;;  %v2465_v42 = vld [vmem:[%s5151_s10 + $0x18] sm:$0xff] }
 0x126   : > { %3196 = vmatprep.subr.mxu0 %v3253_v31  ;;  %3207 = vmatprep.subr.mxu1 %v3253_v31 }
 0x127   : > { %v1138_v13 = vadd.f32 %v2725_v44, %v1068_v43  ;;  %3197 = vmatpush3.msra.mxu0 %v2310_v32  ;;  %3208 = vmatpush3.msra.mxu1 %v2389_v33  ;;  %v2463_v44 = vld [vmem:[%s5151_s10 + $0x8] sm:$0xff]  ;;  %v2311_v43 = vld [vmem:[%s5148_s7] sm:$0x1] }
 0x128   : > { %3198 = vmatprep.subr.mxu0 %v3253_v31  ;;  %3209 = vmatprep.subr.mxu1 %v3253_v31 }
 0x129   : > { %v1208_v22 = vadd.f32 %v2760_v18, %v1138_v13  ;;  %3199 = vmatpush3.msra.mxu0 %v2309_v46  ;;  %3210 = vmatpush3.msra.mxu1 %v2388_v34 }
 0x12a   : > { %3200 = vmatprep.subr.mxu0 %v3253_v31  ;;  %3211 = vmatprep.subr.mxu1 %v3253_v31 }
 0x12b   : > { %3201 = vmatpush3.msra.mxu0 %v2308_v35  ;;  %3212 = vmatpush3.msra.mxu1 %v2387_v36 }
 0x12c   : > { %3202 = vmatprep.subr.mxu0 %v3253_v31  ;;  %3213 = vmatprep.subr.mxu1 %v3253_v31 }
 0x12d   : > { %3203 = vmatpush3.msra.mxu0 %v2307_v37  ;;  %3204 = vmatprep.mubr.msk.f32.mxu0 %vm3254_vm0, %v3253_v31 }
 0x12e   : > { %3214 = vmatpush3.msra.mxu1 %v2386_v38  ;;  %3215 = vmatprep.mubr.msk.f32.mxu1 %vm3254_vm0, %v3253_v31 }
 0x12f   : > { %3218 = vmatprep.subr.mxu0 %v3253_v31 }
 0x13a   : > { %v2793_v9 = vpop.f32.mrf.mxu0 }
 0x13c   : > { %v2828_v11 = vpop.f32.mrf.mxu1  ;;  %v2794_v62 = vpop.f32.mrf.mxu0 }
 0x13d   : > { %v2795_v19 = vadd.f32 %v2794_v62, %v2793_v9  ;;  %v2464_v9 = vld [vmem:[%s5151_s10 + $0x10] sm:$0xff] }
 0x13e   : > { %v2829_v20 = vpop.f32.mrf.mxu1 }
 0x13f   : > { %v1278_v2 = vadd.f32 %v2795_v19, %v1208_v22  ;;  %v2830_v23 = vadd.f32 %v2829_v20, %v2828_v11  ;;  %v2390_v11 = vld [vmem:[%s5150_s9] sm:$0x1] }
 0x141   : > { %v1348_v24 = vadd.f32 %v2830_v23, %v1278_v2 }
 0x15c   : > { %v2863_v8 = vpop.f32.mrf.mxu0 }
 0x15e   : > { %v2898_v45 = vpop.f32.mrf.mxu1  ;;  %v2864_v12 = vpop.f32.mrf.mxu0 }
 0x15f   : > { %v2865_v26 = vadd.f32 %v2864_v12, %v2863_v8  ;;  %v2466_v8 = vld [vmem:[%s5152_s11] sm:$0x1] }
 0x160   : > { %v2899_v27 = vpop.f32.mrf.mxu1 }
 0x161   : > { %v1418_v28 = vadd.f32 %v2865_v26, %v1348_v24  ;;  %v2900_v30 = vadd.f32 %v2899_v27, %v2898_v45 }
 0x163   : > { %v1488_v59 = vadd.f32 %v2900_v30, %v1418_v28 }
 0x165   : > { %2544 = vrot.lane.b32.xlu0 %v1488_v59, %s3252_s19 }
 0x17f   : > { %v2933_v39 = vpop.f32.mrf.mxu0  ;;  %v2968_v41 = vpop.f32.mrf.mxu1 }
 0x181   : > { %v2934_v47 = vpop.f32.mrf.mxu0  ;;  %v2969_v51 = vpop.f32.mrf.mxu1 }
 0x182   : > { %v2935_v52 = vadd.f32 %v2934_v47, %v2933_v39  ;;  %v2970_v53 = vadd.f32 %v2969_v51, %v2968_v41 }
 0x184   : > { %v1884_v57 = vadd.f32 %v2970_v53, %v2935_v52 }
 0x1a0   : > { %v3003_v49 = vpop.f32.mrf.mxu0 }
 0x1a2   : > { %v3038_v48 = vpop.f32.mrf.mxu1  ;;  %v3004_v50 = vpop.f32.mrf.mxu0 }
 0x1a3   : > { %v3005_v55 = vadd.f32 %v3004_v50, %v3003_v49 }
 0x1a4   : > { %v3039_v56 = vpop.f32.mrf.mxu1 }
 0x1a5   : > { %v1954_v60 = vadd.f32 %v3005_v55, %v1884_v57  ;;  %v3040_v21 = vadd.f32 %v3039_v56, %v3038_v48 }
 0x1a7   : > { %v2024_v63 = vadd.f32 %v3040_v21, %v1954_v60 }
 0x1c2   : > { %v3073_v54 = vpop.f32.mrf.mxu0 }
 0x1c4   : > { %v3108_v58 = vpop.f32.mrf.mxu1  ;;  %v3074_v17 = vpop.f32.mrf.mxu0 }
 0x1c5   : > { %v3075_v25 = vadd.f32 %v3074_v17, %v3073_v54 }
 0x1c6   : > { %v3109_v61 = vpop.f32.mrf.mxu1 }
 0x1c7   : > { %v2094_v29 = vadd.f32 %v3075_v25, %v2024_v63  ;;  %v3110_v0 = vadd.f32 %v3109_v61, %v3108_v58 }
 0x1c9   : > { %v2164_v3 = vadd.f32 %v3110_v0, %v2094_v29 }
 0x1d7   : > { %v2545_v7 = vpop.permute.xlu0 %2544 }
 0x1e5   : > { %v3143_v14 = vpop.f32.mrf.mxu0  ;;  %v3178_v1 = vpop.f32.mrf.mxu1 }
 0x1e7   : > { %v3144_v15 = vpop.f32.mrf.mxu0  ;;  %v3179_v16 = vpop.f32.mrf.mxu1 }
 0x1e8   : > { %v3145_v4 = vadd.f32 %v3144_v15, %v3143_v14  ;;  %v3180_v5 = vadd.f32 %v3179_v16, %v3178_v1 }
 0x1ea   : > { %v2234_v40 = vadd.f32 %v3145_v4, %v2164_v3 }
 0x1ec   : > { %v2304_v6 = vadd.f32 %v3180_v5, %v2234_v40 }
 0x1ee   : > { %3205 = vmatmul.mubr.msk.f32.vlgmr.msra.gmra.mxu0 %vm2312_vm1, %v2304_v6  ;;  %3216 = vmatmul.mubr.msk.f32.vlgmr.msra.gmra.mxu1 %vm2312_vm1, %v2304_v6  ;;  %2542 = vst.msk [vmem:[%s5096_s30] sm:$0x1] %vm2541_vm2, %v2304_v6 }
 0x1ef   : > { %3219 = vmatpush3.msra.mxu0 %v2465_v42  ;;  %3226 = vmatprep.mubr.msk.f32.mxu0 %vm3254_vm0, %v3253_v31  ;;  %2548 = vst.msk [vmem:[%s5096_s30] sm:$0x1] %vm2547_vm3, %v2545_v7 }
 0x1f0   : > { %3220 = vmatprep.subr.mxu0 %v3253_v31 }
 0x1f1   : > { %3221 = vmatpush3.msra.mxu0 %v2464_v9 }
 0x1f2   : > { %3222 = vmatprep.subr.mxu0 %v3253_v31 }
 0x1f3   : > { %3223 = vmatpush3.msra.mxu0 %v2463_v44 }
 0x1f4   : > { %3224 = vmatprep.subr.mxu0 %v3253_v31 }
 0x1f5   : > { %3225 = vmatpush3.msra.mxu0 %v2462_v10 }
 0x2ae   : > { %v2382_v62 = vpop.f32.mrf.mxu0  ;;  %v2457_v13 = vpop.f32.mrf.mxu1 }
 0x2af   : > { %v2383_v18 = vadd.f32 %v2382_v62, %v2311_v43  ;;  %v2458_v19 = vadd.f32 %v2457_v13, %v2390_v11 }
 0x2b0   : > { %v3206_v20 = vpop.f32.mrf.mxu0  ;;  %v3217_v22 = vpop.f32.mrf.mxu1 }
 0x2b1   : > { %v2461_v2 = vmax.f32 %v2458_v19, 0.0  ;;  %2550 = vrot.lane.b32.xlu0 %v2383_v18, %s3255_s27 }
 0x2b3   : > { %3227 = vmatmul.mubr.msk.f32.vlgmr.msra.gmra.mxu0 %vm2312_vm1, %v2461_v2 }
 0x323   : > { %v2551_v23 = vpop.permute.xlu0 %2550 }
 0x324   : > { %2554 = vst.msk [vmem:[%s5096_s30] sm:$0x1] %vm2553_vm4, %v2551_v23 }
 0x373   : > { %v2536_v45 = vpop.f32.mrf.mxu0 }
 0x374   : > { %v2537_v12 = vadd.f32 %v2536_v45, %v2466_v8 }
 0x375   : > { %v3228_v24 = vpop.f32.mrf.mxu0 }
 0x376   : > { %2556 = vrot.lane.b32.xlu1 %v2537_v12, %s3256_s29 }
 0x3e8   : > { %v2557_v26 = vpop.permute.xlu1 %2556 }
 0x3e9   : > { %2560 = vst.msk [vmem:[%s5096_s30] sm:$0x1] %vm2559_vm5, %v2557_v26 }
 0x3ea PF: > { %s22_s21 = sadd.s32 1, %s3249_s21  }
 0x3eb   : > { %p19_p4 = scmp.ge.s32.totalorder %s22_s21, 4  }
 0x3ed   :  { %21 = sbr.rel (!%p19_p4) target bundleno = 1 (0x1), region = 98 }

</bundles_post_ra>
